<compile_context>
chip_gen: v7x
topology: tpu7x:2x2x1
jax: 0.10.0
libtpu: 0.0.40
codegen_flags: <defaults>
</compile_context>

<pallas_src>
import jax
import jax.numpy as jnp
import numpy as np
from jax.experimental import pallas as pl
from jax.experimental.pallas import tpu as pltpu


def brnn_kernel(x_ref, h0_ref, c0_ref,
                wihf_ref, wihb_ref, whhf_ref, whhb_ref,
                bgf_ref, bgb_ref,
                wdecf_ref, wdecb_ref, bdec_ref,
                lim_ref, omask_ref,
                out_ref, hn_ref, cn_ref,
                gxf_ref, gxb_ref, hidf_ref, hidb_ref):
    TB = x_ref.shape[0]
    B2, H = h0_ref.shape            # B2 = 2*Bp (rows 0:Bp forward, Bp:2Bp backward)
    Bp = B2 // 2
    T = TB // Bp

    # ---- prologue: hoisted input projection (whole sequence, both directions),
    # bias folded in — two MXU matmuls, off the serial recurrence ----
    x = x_ref[...]
    gxf_ref[...] = (jnp.dot(x, wihf_ref[...], preferred_element_type=jnp.float32)
                    + bgf_ref[...])
    gxb_ref[...] = (jnp.dot(x, wihb_ref[...], preferred_element_type=jnp.float32)
                    + bgb_ref[...])

    # loop-invariant operands hoisted out of the recurrence (vreg-resident)
    whh_f = whhf_ref[...]
    whh_b = whhb_ref[...]
    lim_f = lim_ref[0:Bp, :]        # forward  row valid at step t iff t <  lim_f
    lim_b = lim_ref[Bp:B2, :]       # backward row valid at step t iff t >= lim_b

    h_f = h0_ref[0:Bp, :]
    c_f = c0_ref[0:Bp, :]
    h_b = h0_ref[Bp:B2, :]
    c_b = c0_ref[Bp:B2, :]

    def lstm_cell(gates, c):
        # whole-slab sigmoid (one EUP slab); tanh only on the g quarter
        sig = jax.nn.sigmoid(gates)
        g_g = jnp.tanh(gates[:, 2 * H:3 * H])
        i_g = sig[:, 0:H]
        f_g = sig[:, H:2 * H]
        o_g = sig[:, 3 * H:4 * H]
        c_new = f_g * c + i_g * g_g
        h_new = o_g * jnp.tanh(c_new)
        return h_new, c_new

    # static T -> fully unrolled; every slice is a static sublane-aligned
    # offset (Bp is a multiple of 8).
    # TODO(synk): use lax.fori_loop for large T to bound live ranges.
    for t in range(T):
        tb = T - 1 - t              # backward direction's output timestep

        gates_f = gxf_ref[t * Bp:(t + 1) * Bp, :] + jnp.dot(
            h_f, whh_f, preferred_element_type=jnp.float32)
        gates_b = gxb_ref[tb * Bp:(tb + 1) * Bp, :] + jnp.dot(
            h_b, whh_b, preferred_element_type=jnp.float32)

        hf_new, cf_new = lstm_cell(gates_f, c_f)
        hb_new, cb_new = lstm_cell(gates_b, c_b)

        # packed-sequence semantics: freeze state outside each sequence's
        # valid window (VPU compares on resident vregs, no VMEM load)
        m_f = lim_f > t
        m_b = lim_b <= t
        h_f = jnp.where(m_f, hf_new, h_f)
        c_f = jnp.where(m_f, cf_new, c_f)
        h_b = jnp.where(m_b, hb_new, h_b)
        c_b = jnp.where(m_b, cb_new, c_b)

        # per-direction hidden slabs: lane-0, sublane-aligned stores
        hidf_ref[t * Bp:(t + 1) * Bp, :] = h_f
        hidb_ref[tb * Bp:(tb + 1) * Bp, :] = h_b

    hn_ref[0:Bp, :] = h_f
    hn_ref[Bp:B2, :] = h_b
    cn_ref[0:Bp, :] = c_f
    cn_ref[Bp:B2, :] = c_b

    # ---- epilogue: zero padded rows once, fused two-matmul decoder ----
    om = omask_ref[...]
    out_ref[...] = (
        jnp.dot(hidf_ref[...] * om, wdecf_ref[...],
                preferred_element_type=jnp.float32)
        + jnp.dot(hidb_ref[...] * om, wdecb_ref[...],
                  preferred_element_type=jnp.float32)
        + bdec_ref[...])


def brnn_forward(x, lens, h0, c0, p):
    """x: (B, T, D) batch_first; lens: (B,) descending with max(lens) == T
    (pack_padded_sequence enforce_sorted / pad_packed_sequence semantics);
    h0/c0: (2, B, H)."""
    B, T, D = x.shape
    H = p["w_hh_f"].shape[1]
    O = p["w_lr"].shape[0]
    f32 = jnp.float32
    Bp = max(8, -(-B // 8) * 8)        # pad batch rows to f32 sublane multiple

    # time-major, batch padded with zero rows; flat row index = t*Bp + b
    xt = jnp.transpose(x.astype(f32), (1, 0, 2))                    # (T, B, D)
    x2 = jnp.pad(xt, ((0, 0), (0, Bp - B), (0, 0))).reshape(T * Bp, D)

    def pack_state(s):                  # (2, B, H) -> (2*Bp, H)
        return jnp.pad(s.astype(f32),
                       ((0, 0), (0, Bp - B), (0, 0))).reshape(2 * Bp, H)
    h0c = pack_state(h0)
    c0c = pack_state(c0)

    # weights (PyTorch gate order [i, f, g, o] preserved inside each 4H block)
    wih_f = p["w_ih_f"].T.astype(f32)                               # (D, 4H)
    wih_b = p["w_ih_b"].T.astype(f32)
    whh_f = p["w_hh_f"].T.astype(f32)                               # (H, 4H)
    whh_b = p["w_hh_b"].T.astype(f32)
    bg_f = (p["b_ih_f"] + p["b_hh_f"]).reshape(1, 4 * H).astype(f32)
    bg_b = (p["b_ih_b"] + p["b_hh_b"]).reshape(1, 4 * H).astype(f32)
    wdec_f = p["w_lr"].T.astype(f32)                                # (H, O)
    wdec_b = p["w_rl"].T.astype(f32)
    bdec = (p["b_lr"] + p["b_rl"]).reshape(1, O).astype(f32)

    # vreg-resident validity thresholds (padded batch rows: never valid)
    lens_p = jnp.pad(lens.astype(f32), (0, Bp - B))
    lim_rows = jnp.concatenate([lens_p, T - lens_p])                # (2*Bp,)
    lim = jnp.broadcast_to(lim_rows.reshape(2 * Bp, 1), (2 * Bp, H))

    # output-row mask: zero padded time positions and padded batch rows
    t_idx = jnp.arange(T, dtype=f32)
    omask = (t_idx[:, None] < lens_p[None, :]).astype(f32).reshape(T * Bp, 1)

    vmem = pl.BlockSpec(memory_space=pltpu.MemorySpace.VMEM)
    out2, hn2, cn2 = pl.pallas_call(
        brnn_kernel,
        out_shape=(jax.ShapeDtypeStruct((T * Bp, O), f32),
                   jax.ShapeDtypeStruct((2 * Bp, H), f32),
                   jax.ShapeDtypeStruct((2 * Bp, H), f32)),
        in_specs=[vmem] * 14,
        out_specs=(vmem, vmem, vmem),
        scratch_shapes=[pltpu.VMEM((T * Bp, 4 * H), f32),   # hoisted gx (fwd)
                        pltpu.VMEM((T * Bp, 4 * H), f32),   # hoisted gx (bwd)
                        pltpu.VMEM((T * Bp, H), f32),       # hidden slab (fwd)
                        pltpu.VMEM((T * Bp, H), f32)],      # hidden slab (bwd)
    )(x2, h0c, c0c, wih_f, wih_b, whh_f, whh_b,
      bg_f, bg_b, wdec_f, wdec_b, bdec, lim, omask)

    output = jnp.transpose(out2.reshape(T, Bp, O)[:, :B, :], (1, 0, 2))  # (B,T,O)
    hn = hn2.reshape(2, Bp, H)[:, :B, :]
    cn = cn2.reshape(2, Bp, H)[:, :B, :]
    return output, (hn, cn)


def brnn_ref(x, lens, h0, c0, p):
    """Pure-JAX reference reproducing the PyTorch BRNN.forward semantics."""
    B, T, D = x.shape
    H = p["w_hh_f"].shape[1]

    def cell(x_t, h, c, w_ih, w_hh, b_ih, b_hh):
        gates = x_t @ w_ih.T + h @ w_hh.T + b_ih + b_hh
        i, f, g, o = jnp.split(gates, 4, axis=-1)
        i, f, o = jax.nn.sigmoid(i), jax.nn.sigmoid(f), jax.nn.sigmoid(o)
        g = jnp.tanh(g)
        c_new = f * c + i * g
        h_new = o * jnp.tanh(c_new)
        return h_new, c_new

    def m(t):
        return (t < lens)[:, None]

    h, c = h0[0], c0[0]
    fwd = []
    for t in range(T):
        hn_, cn_ = cell(x[:, t], h, c, p["w_ih_f"], p["w_hh_f"],
                        p["b_ih_f"], p["b_hh_f"])
        fwd.append(jnp.where(m(t), hn_, 0.0))
        h = jnp.where(m(t), hn_, h)
        c = jnp.where(m(t), cn_, c)
    hf, cf = h, c

    h, c = h0[1], c0[1]
    bwd = [None] * T
    for s in range(T):
        t = T - 1 - s
        hn_, cn_ = cell(x[:, t], h, c, p["w_ih_b"], p["w_hh_b"],
                        p["b_ih_b"], p["b_hh_b"])
        bwd[t] = jnp.where(m(t), hn_, 0.0)
        h = jnp.where(m(t), hn_, h)
        c = jnp.where(m(t), cn_, c)
    hb, cb = h, c

    fwd = jnp.stack(fwd, axis=1)        # (B, T, H)
    bwd = jnp.stack(bwd, axis=1)
    out = (fwd @ p["w_lr"].T + p["b_lr"]) + (bwd @ p["w_rl"].T + p["b_rl"])
    return out, (jnp.stack([hf, hb]), jnp.stack([cf, cb]))


if __name__ == "__main__":
    # Small shapes consistent with the module's forward.
    B, T, D, H, O = 2, 8, 8, 32, 16
    key = jax.random.PRNGKey(0)
    ks = jax.random.split(key, 16)

    def u(k, shape, scale=0.1):
        return jax.random.normal(k, shape, jnp.float32) * scale

    params = {
        "w_ih_f": u(ks[0], (4 * H, D)),
        "w_hh_f": u(ks[1], (4 * H, H)),
        "b_ih_f": u(ks[2], (4 * H,)),
        "b_hh_f": u(ks[3], (4 * H,)),
        "w_ih_b": u(ks[4], (4 * H, D)),
        "w_hh_b": u(ks[5], (4 * H, H)),
        "b_ih_b": u(ks[6], (4 * H,)),
        "b_hh_b": u(ks[7], (4 * H,)),
        "w_lr": u(ks[8], (O, H)),
        "b_lr": u(ks[9], (O,)),
        "w_rl": u(ks[10], (O, H)),
        "b_rl": u(ks[11], (O,)),
    }

    x = u(ks[12], (B, T, D), scale=1.0)
    h0 = u(ks[13], (2, B, H))
    c0 = u(ks[14], (2, B, H))
    # lengths, sorted descending (pack_padded_sequence enforce_sorted=True),
    # max(lens) == T so pad_packed_sequence pads back to T.
    lens = jnp.array([T, T - 3], dtype=jnp.int32)

    out, (hn, cn) = jax.block_until_ready(
        jax.jit(brnn_forward)(x, lens, h0, c0, params))

    out_r, (hn_r, cn_r) = brnn_ref(x, lens, h0, c0, params)
    np.testing.assert_allclose(np.asarray(out), np.asarray(out_r),
                               rtol=1e-5, atol=1e-5)
    np.testing.assert_allclose(np.asarray(hn), np.asarray(hn_r),
                               rtol=1e-5, atol=1e-5)
    np.testing.assert_allclose(np.asarray(cn), np.asarray(cn_r),
                               rtol=1e-5, atol=1e-5)

    print("KERNEL_OK")
</pallas_src>

<mosaic_0001>
module attributes {stable_mosaic.version = 11 : i64} {
  func.func @brnn_kernel(%arg0: memref<64x8xf32, #tpu.memory_space<vmem>>, %arg1: memref<16x32xf32, #tpu.memory_space<vmem>>, %arg2: memref<16x32xf32, #tpu.memory_space<vmem>>, %arg3: memref<8x128xf32, #tpu.memory_space<vmem>>, %arg4: memref<8x128xf32, #tpu.memory_space<vmem>>, %arg5: memref<32x128xf32, #tpu.memory_space<vmem>>, %arg6: memref<32x128xf32, #tpu.memory_space<vmem>>, %arg7: memref<1x128xf32, #tpu.memory_space<vmem>>, %arg8: memref<1x128xf32, #tpu.memory_space<vmem>>, %arg9: memref<32x16xf32, #tpu.memory_space<vmem>>, %arg10: memref<32x16xf32, #tpu.memory_space<vmem>>, %arg11: memref<1x16xf32, #tpu.memory_space<vmem>>, %arg12: memref<16x32xf32, #tpu.memory_space<vmem>>, %arg13: memref<64x1xf32, #tpu.memory_space<vmem>>, %arg14: memref<64x16xf32, #tpu.memory_space<vmem>>, %arg15: memref<16x32xf32, #tpu.memory_space<vmem>>, %arg16: memref<16x32xf32, #tpu.memory_space<vmem>>, %arg17: memref<64x128xf32, #tpu.memory_space<vmem>>, %arg18: memref<64x128xf32, #tpu.memory_space<vmem>>, %arg19: memref<64x32xf32, #tpu.memory_space<vmem>>, %arg20: memref<64x32xf32, #tpu.memory_space<vmem>>) attributes {dimension_semantics = [], scalar_prefetch = 0 : i64, scratch_operands = 4 : i64, tpu.core_type = #tpu.core_type<tc>} {
    %c0 = arith.constant 0 : index
    %c0_0 = arith.constant 0 : index
    %0 = vector.load %arg0[%c0, %c0_0] : memref<64x8xf32, #tpu.memory_space<vmem>>, vector<64x8xf32>
    %c0_1 = arith.constant 0 : index
    %c0_2 = arith.constant 0 : index
    %1 = vector.load %arg3[%c0_1, %c0_2] : memref<8x128xf32, #tpu.memory_space<vmem>>, vector<8x128xf32>
    %cst = arith.constant dense<0.000000e+00> : vector<64x128xf32>
    %2 = tpu.matmul %0, %1, %cst {dimension_numbers = #tpu.dot_dimension_numbers<[1], [0], [0], [1], [0, 0, 1, 1], [], []>} : vector<64x8xf32>, vector<8x128xf32>, vector<64x128xf32> -> vector<64x128xf32>
    %c0_3 = arith.constant 0 : index
    %c0_4 = arith.constant 0 : index
    %3 = vector.load %arg7[%c0_3, %c0_4] : memref<1x128xf32, #tpu.memory_space<vmem>>, vector<1x128xf32>
    %4 = vector.broadcast %3 : vector<1x128xf32> to vector<64x128xf32>
    %5 = arith.addf %2, %4 : vector<64x128xf32>
    %c0_5 = arith.constant 0 : index
    %c0_6 = arith.constant 0 : index
    %6 = vector.load %arg17[%c0_5, %c0_6] : memref<64x128xf32, #tpu.memory_space<vmem>>, vector<64x128xf32>
    tpu.vector_store %arg17[%c0_5, %c0_6], %5 {strides = array<i32>} : memref<64x128xf32, #tpu.memory_space<vmem>>, vector<64x128xf32>,
    %c0_7 = arith.constant 0 : index
    %c0_8 = arith.constant 0 : index
    %7 = vector.load %arg4[%c0_7, %c0_8] : memref<8x128xf32, #tpu.memory_space<vmem>>, vector<8x128xf32>
    %cst_9 = arith.constant dense<0.000000e+00> : vector<64x128xf32>
    %8 = tpu.matmul %0, %7, %cst_9 {dimension_numbers = #tpu.dot_dimension_numbers<[1], [0], [0], [1], [0, 0, 1, 1], [], []>} : vector<64x8xf32>, vector<8x128xf32>, vector<64x128xf32> -> vector<64x128xf32>
    %c0_10 = arith.constant 0 : index
    %c0_11 = arith.constant 0 : index
    %9 = vector.load %arg8[%c0_10, %c0_11] : memref<1x128xf32, #tpu.memory_space<vmem>>, vector<1x128xf32>
    %10 = vector.broadcast %9 : vector<1x128xf32> to vector<64x128xf32>
    %11 = arith.addf %8, %10 : vector<64x128xf32>
    %c0_12 = arith.constant 0 : index
    %c0_13 = arith.constant 0 : index
    %12 = vector.load %arg18[%c0_12, %c0_13] : memref<64x128xf32, #tpu.memory_space<vmem>>, vector<64x128xf32>
    tpu.vector_store %arg18[%c0_12, %c0_13], %11 {strides = array<i32>} : memref<64x128xf32, #tpu.memory_space<vmem>>, vector<64x128xf32>,
    %c0_14 = arith.constant 0 : index
    %c0_15 = arith.constant 0 : index
    %13 = vector.load %arg5[%c0_14, %c0_15] : memref<32x128xf32, #tpu.memory_space<vmem>>, vector<32x128xf32>
    %c0_16 = arith.constant 0 : index
    %c0_17 = arith.constant 0 : index
    %14 = vector.load %arg6[%c0_16, %c0_17] : memref<32x128xf32, #tpu.memory_space<vmem>>, vector<32x128xf32>
    %c0_18 = arith.constant 0 : index
    %c0_19 = arith.constant 0 : index
    %15 = vector.load %arg12[%c0_18, %c0_19] : memref<16x32xf32, #tpu.memory_space<vmem>>, vector<8x32xf32>
    %c8 = arith.constant 8 : index
    %c0_20 = arith.constant 0 : index
    %16 = vector.load %arg12[%c8, %c0_20] : memref<16x32xf32, #tpu.memory_space<vmem>>, vector<8x32xf32>
    %c0_21 = arith.constant 0 : index
    %c0_22 = arith.constant 0 : index
    %17 = vector.load %arg1[%c0_21, %c0_22] : memref<16x32xf32, #tpu.memory_space<vmem>>, vector<8x32xf32>
    %c0_23 = arith.constant 0 : index
    %c0_24 = arith.constant 0 : index
    %18 = vector.load %arg2[%c0_23, %c0_24] : memref<16x32xf32, #tpu.memory_space<vmem>>, vector<8x32xf32>
    %c8_25 = arith.constant 8 : index
    %c0_26 = arith.constant 0 : index
    %19 = vector.load %arg1[%c8_25, %c0_26] : memref<16x32xf32, #tpu.memory_space<vmem>>, vector<8x32xf32>
    %c8_27 = arith.constant 8 : index
    %c0_28 = arith.constant 0 : index
    %20 = vector.load %arg2[%c8_27, %c0_28] : memref<16x32xf32, #tpu.memory_space<vmem>>, vector<8x32xf32>
    %c0_29 = arith.constant 0 : index
    %c0_30 = arith.constant 0 : index
    %21 = vector.load %arg17[%c0_29, %c0_30] : memref<64x128xf32, #tpu.memory_space<vmem>>, vector<8x128xf32>
    %cst_31 = arith.constant dense<0.000000e+00> : vector<8x128xf32>
    %22 = tpu.matmul %17, %13, %cst_31 {dimension_numbers = #tpu.dot_dimension_numbers<[1], [0], [0], [1], [0, 0, 1, 1], [], []>} : vector<8x32xf32>, vector<32x128xf32>, vector<8x128xf32> -> vector<8x128xf32>
    %23 = arith.addf %21, %22 : vector<8x128xf32>
    %c56 = arith.constant 56 : index
    %c0_32 = arith.constant 0 : index
    %24 = vector.load %arg18[%c56, %c0_32] : memref<64x128xf32, #tpu.memory_space<vmem>>, vector<8x128xf32>
    %cst_33 = arith.constant dense<0.000000e+00> : vector<8x128xf32>
    %25 = tpu.matmul %19, %14, %cst_33 {dimension_numbers = #tpu.dot_dimension_numbers<[1], [0], [0], [1], [0, 0, 1, 1], [], []>} : vector<8x32xf32>, vector<32x128xf32>, vector<8x128xf32> -> vector<8x128xf32>
    %26 = arith.addf %24, %25 : vector<8x128xf32>
    %27 = arith.negf %23 : vector<8x128xf32>
    %28 = math.exp %27 : vector<8x128xf32>
    %cst_34 = arith.constant 1.000000e+00 : f32
    %29 = vector.broadcast %cst_34 : f32 to vector<8x128xf32>
    %30 = arith.addf %29, %28 : vector<8x128xf32>
    %31 = arith.divf %29, %30 : vector<8x128xf32>
    %32 = vector.extract_strided_slice %23 {offsets = [0, 64], sizes = [8, 32], strides = [1, 1]} : vector<8x128xf32> to vector<8x32xf32>
    %33 = math.tanh %32 : vector<8x32xf32>
    %34 = vector.extract_strided_slice %31 {offsets = [0, 0], sizes = [8, 32], strides = [1, 1]} : vector<8x128xf32> to vector<8x32xf32>
    %35 = vector.extract_strided_slice %31 {offsets = [0, 32], sizes = [8, 32], strides = [1, 1]} : vector<8x128xf32> to vector<8x32xf32>
    %36 = vector.extract_strided_slice %31 {offsets = [0, 96], sizes = [8, 32], strides = [1, 1]} : vector<8x128xf32> to vector<8x32xf32>
    %37 = arith.mulf %35, %18 : vector<8x32xf32>
    %38 = arith.mulf %34, %33 : vector<8x32xf32>
    %39 = arith.addf %37, %38 : vector<8x32xf32>
    %40 = math.tanh %39 : vector<8x32xf32>
    %41 = arith.mulf %36, %40 : vector<8x32xf32>
    %42 = arith.negf %26 : vector<8x128xf32>
    %43 = math.exp %42 : vector<8x128xf32>
    %cst_35 = arith.constant 1.000000e+00 : f32
    %44 = vector.broadcast %cst_35 : f32 to vector<8x128xf32>
    %45 = arith.addf %44, %43 : vector<8x128xf32>
    %46 = arith.divf %44, %45 : vector<8x128xf32>
    %47 = vector.extract_strided_slice %26 {offsets = [0, 64], sizes = [8, 32], strides = [1, 1]} : vector<8x128xf32> to vector<8x32xf32>
    %48 = math.tanh %47 : vector<8x32xf32>
    %49 = vector.extract_strided_slice %46 {offsets = [0, 0], sizes = [8, 32], strides = [1, 1]} : vector<8x128xf32> to vector<8x32xf32>
    %50 = vector.extract_strided_slice %46 {offsets = [0, 32], sizes = [8, 32], strides = [1, 1]} : vector<8x128xf32> to vector<8x32xf32>
    %51 = vector.extract_strided_slice %46 {offsets = [0, 96], sizes = [8, 32], strides = [1, 1]} : vector<8x128xf32> to vector<8x32xf32>
    %52 = arith.mulf %50, %20 : vector<8x32xf32>
    %53 = arith.mulf %49, %48 : vector<8x32xf32>
    %54 = arith.addf %52, %53 : vector<8x32xf32>
    %55 = math.tanh %54 : vector<8x32xf32>
    %56 = arith.mulf %51, %55 : vector<8x32xf32>
    %cst_36 = arith.constant 0.000000e+00 : f32
    %57 = vector.broadcast %cst_36 : f32 to vector<8x32xf32>
    %58 = arith.cmpf ogt, %15, %57 : vector<8x32xf32>
    %cst_37 = arith.constant 0.000000e+00 : f32
    %59 = vector.broadcast %cst_37 : f32 to vector<8x32xf32>
    %60 = arith.cmpf ole, %16, %59 : vector<8x32xf32>
    %61 = arith.select %58, %41, %17 : vector<8x32xi1>, vector<8x32xf32>
    %62 = arith.select %58, %39, %18 : vector<8x32xi1>, vector<8x32xf32>
    %63 = arith.select %60, %56, %19 : vector<8x32xi1>, vector<8x32xf32>
    %64 = arith.select %60, %54, %20 : vector<8x32xi1>, vector<8x32xf32>
    %c0_38 = arith.constant 0 : index
    %c0_39 = arith.constant 0 : index
    %65 = vector.load %arg19[%c0_38, %c0_39] : memref<64x32xf32, #tpu.memory_space<vmem>>, vector<8x32xf32>
    tpu.vector_store %arg19[%c0_38, %c0_39], %61 {strides = array<i32>} : memref<64x32xf32, #tpu.memory_space<vmem>>, vector<8x32xf32>,
    %c56_40 = arith.constant 56 : index
    %c0_41 = arith.constant 0 : index
    %66 = vector.load %arg20[%c56_40, %c0_41] : memref<64x32xf32, #tpu.memory_space<vmem>>, vector<8x32xf32>
    tpu.vector_store %arg20[%c56_40, %c0_41], %63 {strides = array<i32>} : memref<64x32xf32, #tpu.memory_space<vmem>>, vector<8x32xf32>,
    %c8_42 = arith.constant 8 : index
    %c0_43 = arith.constant 0 : index
    %67 = vector.load %arg17[%c8_42, %c0_43] : memref<64x128xf32, #tpu.memory_space<vmem>>, vector<8x128xf32>
    %cst_44 = arith.constant dense<0.000000e+00> : vector<8x128xf32>
    %68 = tpu.matmul %61, %13, %cst_44 {dimension_numbers = #tpu.dot_dimension_numbers<[1], [0], [0], [1], [0, 0, 1, 1], [], []>} : vector<8x32xf32>, vector<32x128xf32>, vector<8x128xf32> -> vector<8x128xf32>
    %69 = arith.addf %67, %68 : vector<8x128xf32>
    %c48 = arith.constant 48 : index
    %c0_45 = arith.constant 0 : index
    %70 = vector.load %arg18[%c48, %c0_45] : memref<64x128xf32, #tpu.memory_space<vmem>>, vector<8x128xf32>
    %cst_46 = arith.constant dense<0.000000e+00> : vector<8x128xf32>
    %71 = tpu.matmul %63, %14, %cst_46 {dimension_numbers = #tpu.dot_dimension_numbers<[1], [0], [0], [1], [0, 0, 1, 1], [], []>} : vector<8x32xf32>, vector<32x128xf32>, vector<8x128xf32> -> vector<8x128xf32>
    %72 = arith.addf %70, %71 : vector<8x128xf32>
    %73 = arith.negf %69 : vector<8x128xf32>
    %74 = math.exp %73 : vector<8x128xf32>
    %cst_47 = arith.constant 1.000000e+00 : f32
    %75 = vector.broadcast %cst_47 : f32 to vector<8x128xf32>
    %76 = arith.addf %75, %74 : vector<8x128xf32>
    %77 = arith.divf %75, %76 : vector<8x128xf32>
    %78 = vector.extract_strided_slice %69 {offsets = [0, 64], sizes = [8, 32], strides = [1, 1]} : vector<8x128xf32> to vector<8x32xf32>
    %79 = math.tanh %78 : vector<8x32xf32>
    %80 = vector.extract_strided_slice %77 {offsets = [0, 0], sizes = [8, 32], strides = [1, 1]} : vector<8x128xf32> to vector<8x32xf32>
    %81 = vector.extract_strided_slice %77 {offsets = [0, 32], sizes = [8, 32], strides = [1, 1]} : vector<8x128xf32> to vector<8x32xf32>
    %82 = vector.extract_strided_slice %77 {offsets = [0, 96], sizes = [8, 32], strides = [1, 1]} : vector<8x128xf32> to vector<8x32xf32>
    %83 = arith.mulf %81, %62 : vector<8x32xf32>
    %84 = arith.mulf %80, %79 : vector<8x32xf32>
    %85 = arith.addf %83, %84 : vector<8x32xf32>
    %86 = math.tanh %85 : vector<8x32xf32>
    %87 = arith.mulf %82, %86 : vector<8x32xf32>
    %88 = arith.negf %72 : vector<8x128xf32>
    %89 = math.exp %88 : vector<8x128xf32>
    %cst_48 = arith.constant 1.000000e+00 : f32
    %90 = vector.broadcast %cst_48 : f32 to vector<8x128xf32>
    %91 = arith.addf %90, %89 : vector<8x128xf32>
    %92 = arith.divf %90, %91 : vector<8x128xf32>
    %93 = vector.extract_strided_slice %72 {offsets = [0, 64], sizes = [8, 32], strides = [1, 1]} : vector<8x128xf32> to vector<8x32xf32>
    %94 = math.tanh %93 : vector<8x32xf32>
    %95 = vector.extract_strided_slice %92 {offsets = [0, 0], sizes = [8, 32], strides = [1, 1]} : vector<8x128xf32> to vector<8x32xf32>
    %96 = vector.extract_strided_slice %92 {offsets = [0, 32], sizes = [8, 32], strides = [1, 1]} : vector<8x128xf32> to vector<8x32xf32>
    %97 = vector.extract_strided_slice %92 {offsets = [0, 96], sizes = [8, 32], strides = [1, 1]} : vector<8x128xf32> to vector<8x32xf32>
    %98 = arith.mulf %96, %64 : vector<8x32xf32>
    %99 = arith.mulf %95, %94 : vector<8x32xf32>
    %100 = arith.addf %98, %99 : vector<8x32xf32>
    %101 = math.tanh %100 : vector<8x32xf32>
    %102 = arith.mulf %97, %101 : vector<8x32xf32>
    %cst_49 = arith.constant 1.000000e+00 : f32
    %103 = vector.broadcast %cst_49 : f32 to vector<8x32xf32>
    %104 = arith.cmpf ogt, %15, %103 : vector<8x32xf32>
    %cst_50 = arith.constant 1.000000e+00 : f32
    %105 = vector.broadcast %cst_50 : f32 to vector<8x32xf32>
    %106 = arith.cmpf ole, %16, %105 : vector<8x32xf32>
    %107 = arith.select %104, %87, %61 : vector<8x32xi1>, vector<8x32xf32>
    %108 = arith.select %104, %85, %62 : vector<8x32xi1>, vector<8x32xf32>
    %109 = arith.select %106, %102, %63 : vector<8x32xi1>, vector<8x32xf32>
    %110 = arith.select %106, %100, %64 : vector<8x32xi1>, vector<8x32xf32>
    %c8_51 = arith.constant 8 : index
    %c0_52 = arith.constant 0 : index
    %111 = vector.load %arg19[%c8_51, %c0_52] : memref<64x32xf32, #tpu.memory_space<vmem>>, vector<8x32xf32>
    tpu.vector_store %arg19[%c8_51, %c0_52], %107 {strides = array<i32>} : memref<64x32xf32, #tpu.memory_space<vmem>>, vector<8x32xf32>,
    %c48_53 = arith.constant 48 : index
    %c0_54 = arith.constant 0 : index
    %112 = vector.load %arg20[%c48_53, %c0_54] : memref<64x32xf32, #tpu.memory_space<vmem>>, vector<8x32xf32>
    tpu.vector_store %arg20[%c48_53, %c0_54], %109 {strides = array<i32>} : memref<64x32xf32, #tpu.memory_space<vmem>>, vector<8x32xf32>,
    %c16 = arith.constant 16 : index
    %c0_55 = arith.constant 0 : index
    %113 = vector.load %arg17[%c16, %c0_55] : memref<64x128xf32, #tpu.memory_space<vmem>>, vector<8x128xf32>
    %cst_56 = arith.constant dense<0.000000e+00> : vector<8x128xf32>
    %114 = tpu.matmul %107, %13, %cst_56 {dimension_numbers = #tpu.dot_dimension_numbers<[1], [0], [0], [1], [0, 0, 1, 1], [], []>} : vector<8x32xf32>, vector<32x128xf32>, vector<8x128xf32> -> vector<8x128xf32>
    %115 = arith.addf %113, %114 : vector<8x128xf32>
    %c40 = arith.constant 40 : index
    %c0_57 = arith.constant 0 : index
    %116 = vector.load %arg18[%c40, %c0_57] : memref<64x128xf32, #tpu.memory_space<vmem>>, vector<8x128xf32>
    %cst_58 = arith.constant dense<0.000000e+00> : vector<8x128xf32>
    %117 = tpu.matmul %109, %14, %cst_58 {dimension_numbers = #tpu.dot_dimension_numbers<[1], [0], [0], [1], [0, 0, 1, 1], [], []>} : vector<8x32xf32>, vector<32x128xf32>, vector<8x128xf32> -> vector<8x128xf32>
    %118 = arith.addf %116, %117 : vector<8x128xf32>
    %119 = arith.negf %115 : vector<8x128xf32>
    %120 = math.exp %119 : vector<8x128xf32>
    %cst_59 = arith.constant 1.000000e+00 : f32
    %121 = vector.broadcast %cst_59 : f32 to vector<8x128xf32>
    %122 = arith.addf %121, %120 : vector<8x128xf32>
    %123 = arith.divf %121, %122 : vector<8x128xf32>
    %124 = vector.extract_strided_slice %115 {offsets = [0, 64], sizes = [8, 32], strides = [1, 1]} : vector<8x128xf32> to vector<8x32xf32>
    %125 = math.tanh %124 : vector<8x32xf32>
    %126 = vector.extract_strided_slice %123 {offsets = [0, 0], sizes = [8, 32], strides = [1, 1]} : vector<8x128xf32> to vector<8x32xf32>
    %127 = vector.extract_strided_slice %123 {offsets = [0, 32], sizes = [8, 32], strides = [1, 1]} : vector<8x128xf32> to vector<8x32xf32>
    %128 = vector.extract_strided_slice %123 {offsets = [0, 96], sizes = [8, 32], strides = [1, 1]} : vector<8x128xf32> to vector<8x32xf32>
    %129 = arith.mulf %127, %108 : vector<8x32xf32>
    %130 = arith.mulf %126, %125 : vector<8x32xf32>
    %131 = arith.addf %129, %130 : vector<8x32xf32>
    %132 = math.tanh %131 : vector<8x32xf32>
    %133 = arith.mulf %128, %132 : vector<8x32xf32>
    %134 = arith.negf %118 : vector<8x128xf32>
    %135 = math.exp %134 : vector<8x128xf32>
    %cst_60 = arith.constant 1.000000e+00 : f32
    %136 = vector.broadcast %cst_60 : f32 to vector<8x128xf32>
    %137 = arith.addf %136, %135 : vector<8x128xf32>
    %138 = arith.divf %136, %137 : vector<8x128xf32>
    %139 = vector.extract_strided_slice %118 {offsets = [0, 64], sizes = [8, 32], strides = [1, 1]} : vector<8x128xf32> to vector<8x32xf32>
    %140 = math.tanh %139 : vector<8x32xf32>
    %141 = vector.extract_strided_slice %138 {offsets = [0, 0], sizes = [8, 32], strides = [1, 1]} : vector<8x128xf32> to vector<8x32xf32>
    %142 = vector.extract_strided_slice %138 {offsets = [0, 32], sizes = [8, 32], strides = [1, 1]} : vector<8x128xf32> to vector<8x32xf32>
    %143 = vector.extract_strided_slice %138 {offsets = [0, 96], sizes = [8, 32], strides = [1, 1]} : vector<8x128xf32> to vector<8x32xf32>
    %144 = arith.mulf %142, %110 : vector<8x32xf32>
    %145 = arith.mulf %141, %140 : vector<8x32xf32>
    %146 = arith.addf %144, %145 : vector<8x32xf32>
    %147 = math.tanh %146 : vector<8x32xf32>
    %148 = arith.mulf %143, %147 : vector<8x32xf32>
    %cst_61 = arith.constant 2.000000e+00 : f32
    %149 = vector.broadcast %cst_61 : f32 to vector<8x32xf32>
    %150 = arith.cmpf ogt, %15, %149 : vector<8x32xf32>
    %cst_62 = arith.constant 2.000000e+00 : f32
    %151 = vector.broadcast %cst_62 : f32 to vector<8x32xf32>
    %152 = arith.cmpf ole, %16, %151 : vector<8x32xf32>
    %153 = arith.select %150, %133, %107 : vector<8x32xi1>, vector<8x32xf32>
    %154 = arith.select %150, %131, %108 : vector<8x32xi1>, vector<8x32xf32>
    %155 = arith.select %152, %148, %109 : vector<8x32xi1>, vector<8x32xf32>
    %156 = arith.select %152, %146, %110 : vector<8x32xi1>, vector<8x32xf32>
    %c16_63 = arith.constant 16 : index
    %c0_64 = arith.constant 0 : index
    %157 = vector.load %arg19[%c16_63, %c0_64] : memref<64x32xf32, #tpu.memory_space<vmem>>, vector<8x32xf32>
    tpu.vector_store %arg19[%c16_63, %c0_64], %153 {strides = array<i32>} : memref<64x32xf32, #tpu.memory_space<vmem>>, vector<8x32xf32>,
    %c40_65 = arith.constant 40 : index
    %c0_66 = arith.constant 0 : index
    %158 = vector.load %arg20[%c40_65, %c0_66] : memref<64x32xf32, #tpu.memory_space<vmem>>, vector<8x32xf32>
    tpu.vector_store %arg20[%c40_65, %c0_66], %155 {strides = array<i32>} : memref<64x32xf32, #tpu.memory_space<vmem>>, vector<8x32xf32>,
    %c24 = arith.constant 24 : index
    %c0_67 = arith.constant 0 : index
    %159 = vector.load %arg17[%c24, %c0_67] : memref<64x128xf32, #tpu.memory_space<vmem>>, vector<8x128xf32>
    %cst_68 = arith.constant dense<0.000000e+00> : vector<8x128xf32>
    %160 = tpu.matmul %153, %13, %cst_68 {dimension_numbers = #tpu.dot_dimension_numbers<[1], [0], [0], [1], [0, 0, 1, 1], [], []>} : vector<8x32xf32>, vector<32x128xf32>, vector<8x128xf32> -> vector<8x128xf32>
    %161 = arith.addf %159, %160 : vector<8x128xf32>
    %c32 = arith.constant 32 : index
    %c0_69 = arith.constant 0 : index
    %162 = vector.load %arg18[%c32, %c0_69] : memref<64x128xf32, #tpu.memory_space<vmem>>, vector<8x128xf32>
    %cst_70 = arith.constant dense<0.000000e+00> : vector<8x128xf32>
    %163 = tpu.matmul %155, %14, %cst_70 {dimension_numbers = #tpu.dot_dimension_numbers<[1], [0], [0], [1], [0, 0, 1, 1], [], []>} : vector<8x32xf32>, vector<32x128xf32>, vector<8x128xf32> -> vector<8x128xf32>
    %164 = arith.addf %162, %163 : vector<8x128xf32>
    %165 = arith.negf %161 : vector<8x128xf32>
    %166 = math.exp %165 : vector<8x128xf32>
    %cst_71 = arith.constant 1.000000e+00 : f32
    %167 = vector.broadcast %cst_71 : f32 to vector<8x128xf32>
    %168 = arith.addf %167, %166 : vector<8x128xf32>
    %169 = arith.divf %167, %168 : vector<8x128xf32>
    %170 = vector.extract_strided_slice %161 {offsets = [0, 64], sizes = [8, 32], strides = [1, 1]} : vector<8x128xf32> to vector<8x32xf32>
    %171 = math.tanh %170 : vector<8x32xf32>
    %172 = vector.extract_strided_slice %169 {offsets = [0, 0], sizes = [8, 32], strides = [1, 1]} : vector<8x128xf32> to vector<8x32xf32>
    %173 = vector.extract_strided_slice %169 {offsets = [0, 32], sizes = [8, 32], strides = [1, 1]} : vector<8x128xf32> to vector<8x32xf32>
    %174 = vector.extract_strided_slice %169 {offsets = [0, 96], sizes = [8, 32], strides = [1, 1]} : vector<8x128xf32> to vector<8x32xf32>
    %175 = arith.mulf %173, %154 : vector<8x32xf32>
    %176 = arith.mulf %172, %171 : vector<8x32xf32>
    %177 = arith.addf %175, %176 : vector<8x32xf32>
    %178 = math.tanh %177 : vector<8x32xf32>
    %179 = arith.mulf %174, %178 : vector<8x32xf32>
    %180 = arith.negf %164 : vector<8x128xf32>
    %181 = math.exp %180 : vector<8x128xf32>
    %cst_72 = arith.constant 1.000000e+00 : f32
    %182 = vector.broadcast %cst_72 : f32 to vector<8x128xf32>
    %183 = arith.addf %182, %181 : vector<8x128xf32>
    %184 = arith.divf %182, %183 : vector<8x128xf32>
    %185 = vector.extract_strided_slice %164 {offsets = [0, 64], sizes = [8, 32], strides = [1, 1]} : vector<8x128xf32> to vector<8x32xf32>
    %186 = math.tanh %185 : vector<8x32xf32>
    %187 = vector.extract_strided_slice %184 {offsets = [0, 0], sizes = [8, 32], strides = [1, 1]} : vector<8x128xf32> to vector<8x32xf32>
    %188 = vector.extract_strided_slice %184 {offsets = [0, 32], sizes = [8, 32], strides = [1, 1]} : vector<8x128xf32> to vector<8x32xf32>
    %189 = vector.extract_strided_slice %184 {offsets = [0, 96], sizes = [8, 32], strides = [1, 1]} : vector<8x128xf32> to vector<8x32xf32>
    %190 = arith.mulf %188, %156 : vector<8x32xf32>
    %191 = arith.mulf %187, %186 : vector<8x32xf32>
    %192 = arith.addf %190, %191 : vector<8x32xf32>
    %193 = math.tanh %192 : vector<8x32xf32>
    %194 = arith.mulf %189, %193 : vector<8x32xf32>
    %cst_73 = arith.constant 3.000000e+00 : f32
    %195 = vector.broadcast %cst_73 : f32 to vector<8x32xf32>
    %196 = arith.cmpf ogt, %15, %195 : vector<8x32xf32>
    %cst_74 = arith.constant 3.000000e+00 : f32
    %197 = vector.broadcast %cst_74 : f32 to vector<8x32xf32>
    %198 = arith.cmpf ole, %16, %197 : vector<8x32xf32>
    %199 = arith.select %196, %179, %153 : vector<8x32xi1>, vector<8x32xf32>
    %200 = arith.select %196, %177, %154 : vector<8x32xi1>, vector<8x32xf32>
    %201 = arith.select %198, %194, %155 : vector<8x32xi1>, vector<8x32xf32>
    %202 = arith.select %198, %192, %156 : vector<8x32xi1>, vector<8x32xf32>
    %c24_75 = arith.constant 24 : index
    %c0_76 = arith.constant 0 : index
    %203 = vector.load %arg19[%c24_75, %c0_76] : memref<64x32xf32, #tpu.memory_space<vmem>>, vector<8x32xf32>
    tpu.vector_store %arg19[%c24_75, %c0_76], %199 {strides = array<i32>} : memref<64x32xf32, #tpu.memory_space<vmem>>, vector<8x32xf32>,
    %c32_77 = arith.constant 32 : index
    %c0_78 = arith.constant 0 : index
    %204 = vector.load %arg20[%c32_77, %c0_78] : memref<64x32xf32, #tpu.memory_space<vmem>>, vector<8x32xf32>
    tpu.vector_store %arg20[%c32_77, %c0_78], %201 {strides = array<i32>} : memref<64x32xf32, #tpu.memory_space<vmem>>, vector<8x32xf32>,
    %c32_79 = arith.constant 32 : index
    %c0_80 = arith.constant 0 : index
    %205 = vector.load %arg17[%c32_79, %c0_80] : memref<64x128xf32, #tpu.memory_space<vmem>>, vector<8x128xf32>
    %cst_81 = arith.constant dense<0.000000e+00> : vector<8x128xf32>
    %206 = tpu.matmul %199, %13, %cst_81 {dimension_numbers = #tpu.dot_dimension_numbers<[1], [0], [0], [1], [0, 0, 1, 1], [], []>} : vector<8x32xf32>, vector<32x128xf32>, vector<8x128xf32> -> vector<8x128xf32>
    %207 = arith.addf %205, %206 : vector<8x128xf32>
    %c24_82 = arith.constant 24 : index
    %c0_83 = arith.constant 0 : index
    %208 = vector.load %arg18[%c24_82, %c0_83] : memref<64x128xf32, #tpu.memory_space<vmem>>, vector<8x128xf32>
    %cst_84 = arith.constant dense<0.000000e+00> : vector<8x128xf32>
    %209 = tpu.matmul %201, %14, %cst_84 {dimension_numbers = #tpu.dot_dimension_numbers<[1], [0], [0], [1], [0, 0, 1, 1], [], []>} : vector<8x32xf32>, vector<32x128xf32>, vector<8x128xf32> -> vector<8x128xf32>
    %210 = arith.addf %208, %209 : vector<8x128xf32>
    %211 = arith.negf %207 : vector<8x128xf32>
    %212 = math.exp %211 : vector<8x128xf32>
    %cst_85 = arith.constant 1.000000e+00 : f32
    %213 = vector.broadcast %cst_85 : f32 to vector<8x128xf32>
    %214 = arith.addf %213, %212 : vector<8x128xf32>
    %215 = arith.divf %213, %214 : vector<8x128xf32>
    %216 = vector.extract_strided_slice %207 {offsets = [0, 64], sizes = [8, 32], strides = [1, 1]} : vector<8x128xf32> to vector<8x32xf32>
    %217 = math.tanh %216 : vector<8x32xf32>
    %218 = vector.extract_strided_slice %215 {offsets = [0, 0], sizes = [8, 32], strides = [1, 1]} : vector<8x128xf32> to vector<8x32xf32>
    %219 = vector.extract_strided_slice %215 {offsets = [0, 32], sizes = [8, 32], strides = [1, 1]} : vector<8x128xf32> to vector<8x32xf32>
    %220 = vector.extract_strided_slice %215 {offsets = [0, 96], sizes = [8, 32], strides = [1, 1]} : vector<8x128xf32> to vector<8x32xf32>
    %221 = arith.mulf %219, %200 : vector<8x32xf32>
    %222 = arith.mulf %218, %217 : vector<8x32xf32>
    %223 = arith.addf %221, %222 : vector<8x32xf32>
    %224 = math.tanh %223 : vector<8x32xf32>
    %225 = arith.mulf %220, %224 : vector<8x32xf32>
    %226 = arith.negf %210 : vector<8x128xf32>
    %227 = math.exp %226 : vector<8x128xf32>
    %cst_86 = arith.constant 1.000000e+00 : f32
    %228 = vector.broadcast %cst_86 : f32 to vector<8x128xf32>
    %229 = arith.addf %228, %227 : vector<8x128xf32>
    %230 = arith.divf %228, %229 : vector<8x128xf32>
    %231 = vector.extract_strided_slice %210 {offsets = [0, 64], sizes = [8, 32], strides = [1, 1]} : vector<8x128xf32> to vector<8x32xf32>
    %232 = math.tanh %231 : vector<8x32xf32>
    %233 = vector.extract_strided_slice %230 {offsets = [0, 0], sizes = [8, 32], strides = [1, 1]} : vector<8x128xf32> to vector<8x32xf32>
    %234 = vector.extract_strided_slice %230 {offsets = [0, 32], sizes = [8, 32], strides = [1, 1]} : vector<8x128xf32> to vector<8x32xf32>
    %235 = vector.extract_strided_slice %230 {offsets = [0, 96], sizes = [8, 32], strides = [1, 1]} : vector<8x128xf32> to vector<8x32xf32>
    %236 = arith.mulf %234, %202 : vector<8x32xf32>
    %237 = arith.mulf %233, %232 : vector<8x32xf32>
    %238 = arith.addf %236, %237 : vector<8x32xf32>
    %239 = math.tanh %238 : vector<8x32xf32>
    %240 = arith.mulf %235, %239 : vector<8x32xf32>
    %cst_87 = arith.constant 4.000000e+00 : f32
    %241 = vector.broadcast %cst_87 : f32 to vector<8x32xf32>
    %242 = arith.cmpf ogt, %15, %241 : vector<8x32xf32>
    %cst_88 = arith.constant 4.000000e+00 : f32
    %243 = vector.broadcast %cst_88 : f32 to vector<8x32xf32>
    %244 = arith.cmpf ole, %16, %243 : vector<8x32xf32>
    %245 = arith.select %242, %225, %199 : vector<8x32xi1>, vector<8x32xf32>
    %246 = arith.select %242, %223, %200 : vector<8x32xi1>, vector<8x32xf32>
    %247 = arith.select %244, %240, %201 : vector<8x32xi1>, vector<8x32xf32>
    %248 = arith.select %244, %238, %202 : vector<8x32xi1>, vector<8x32xf32>
    %c32_89 = arith.constant 32 : index
    %c0_90 = arith.constant 0 : index
    %249 = vector.load %arg19[%c32_89, %c0_90] : memref<64x32xf32, #tpu.memory_space<vmem>>, vector<8x32xf32>
    tpu.vector_store %arg19[%c32_89, %c0_90], %245 {strides = array<i32>} : memref<64x32xf32, #tpu.memory_space<vmem>>, vector<8x32xf32>,
    %c24_91 = arith.constant 24 : index
    %c0_92 = arith.constant 0 : index
    %250 = vector.load %arg20[%c24_91, %c0_92] : memref<64x32xf32, #tpu.memory_space<vmem>>, vector<8x32xf32>
    tpu.vector_store %arg20[%c24_91, %c0_92], %247 {strides = array<i32>} : memref<64x32xf32, #tpu.memory_space<vmem>>, vector<8x32xf32>,
    %c40_93 = arith.constant 40 : index
    %c0_94 = arith.constant 0 : index
    %251 = vector.load %arg17[%c40_93, %c0_94] : memref<64x128xf32, #tpu.memory_space<vmem>>, vector<8x128xf32>
    %cst_95 = arith.constant dense<0.000000e+00> : vector<8x128xf32>
    %252 = tpu.matmul %245, %13, %cst_95 {dimension_numbers = #tpu.dot_dimension_numbers<[1], [0], [0], [1], [0, 0, 1, 1], [], []>} : vector<8x32xf32>, vector<32x128xf32>, vector<8x128xf32> -> vector<8x128xf32>
    %253 = arith.addf %251, %252 : vector<8x128xf32>
    %c16_96 = arith.constant 16 : index
    %c0_97 = arith.constant 0 : index
    %254 = vector.load %arg18[%c16_96, %c0_97] : memref<64x128xf32, #tpu.memory_space<vmem>>, vector<8x128xf32>
    %cst_98 = arith.constant dense<0.000000e+00> : vector<8x128xf32>
    %255 = tpu.matmul %247, %14, %cst_98 {dimension_numbers = #tpu.dot_dimension_numbers<[1], [0], [0], [1], [0, 0, 1, 1], [], []>} : vector<8x32xf32>, vector<32x128xf32>, vector<8x128xf32> -> vector<8x128xf32>
    %256 = arith.addf %254, %255 : vector<8x128xf32>
    %257 = arith.negf %253 : vector<8x128xf32>
    %258 = math.exp %257 : vector<8x128xf32>
    %cst_99 = arith.constant 1.000000e+00 : f32
    %259 = vector.broadcast %cst_99 : f32 to vector<8x128xf32>
    %260 = arith.addf %259, %258 : vector<8x128xf32>
    %261 = arith.divf %259, %260 : vector<8x128xf32>
    %262 = vector.extract_strided_slice %253 {offsets = [0, 64], sizes = [8, 32], strides = [1, 1]} : vector<8x128xf32> to vector<8x32xf32>
    %263 = math.tanh %262 : vector<8x32xf32>
    %264 = vector.extract_strided_slice %261 {offsets = [0, 0], sizes = [8, 32], strides = [1, 1]} : vector<8x128xf32> to vector<8x32xf32>
    %265 = vector.extract_strided_slice %261 {offsets = [0, 32], sizes = [8, 32], strides = [1, 1]} : vector<8x128xf32> to vector<8x32xf32>
    %266 = vector.extract_strided_slice %261 {offsets = [0, 96], sizes = [8, 32], strides = [1, 1]} : vector<8x128xf32> to vector<8x32xf32>
    %267 = arith.mulf %265, %246 : vector<8x32xf32>
    %268 = arith.mulf %264, %263 : vector<8x32xf32>
    %269 = arith.addf %267, %268 : vector<8x32xf32>
    %270 = math.tanh %269 : vector<8x32xf32>
    %271 = arith.mulf %266, %270 : vector<8x32xf32>
    %272 = arith.negf %256 : vector<8x128xf32>
    %273 = math.exp %272 : vector<8x128xf32>
    %cst_100 = arith.constant 1.000000e+00 : f32
    %274 = vector.broadcast %cst_100 : f32 to vector<8x128xf32>
    %275 = arith.addf %274, %273 : vector<8x128xf32>
    %276 = arith.divf %274, %275 : vector<8x128xf32>
    %277 = vector.extract_strided_slice %256 {offsets = [0, 64], sizes = [8, 32], strides = [1, 1]} : vector<8x128xf32> to vector<8x32xf32>
    %278 = math.tanh %277 : vector<8x32xf32>
    %279 = vector.extract_strided_slice %276 {offsets = [0, 0], sizes = [8, 32], strides = [1, 1]} : vector<8x128xf32> to vector<8x32xf32>
    %280 = vector.extract_strided_slice %276 {offsets = [0, 32], sizes = [8, 32], strides = [1, 1]} : vector<8x128xf32> to vector<8x32xf32>
    %281 = vector.extract_strided_slice %276 {offsets = [0, 96], sizes = [8, 32], strides = [1, 1]} : vector<8x128xf32> to vector<8x32xf32>
    %282 = arith.mulf %280, %248 : vector<8x32xf32>
    %283 = arith.mulf %279, %278 : vector<8x32xf32>
    %284 = arith.addf %282, %283 : vector<8x32xf32>
    %285 = math.tanh %284 : vector<8x32xf32>
    %286 = arith.mulf %281, %285 : vector<8x32xf32>
    %cst_101 = arith.constant 5.000000e+00 : f32
    %287 = vector.broadcast %cst_101 : f32 to vector<8x32xf32>
    %288 = arith.cmpf ogt, %15, %287 : vector<8x32xf32>
    %cst_102 = arith.constant 5.000000e+00 : f32
    %289 = vector.broadcast %cst_102 : f32 to vector<8x32xf32>
    %290 = arith.cmpf ole, %16, %289 : vector<8x32xf32>
    %291 = arith.select %288, %271, %245 : vector<8x32xi1>, vector<8x32xf32>
    %292 = arith.select %288, %269, %246 : vector<8x32xi1>, vector<8x32xf32>
    %293 = arith.select %290, %286, %247 : vector<8x32xi1>, vector<8x32xf32>
    %294 = arith.select %290, %284, %248 : vector<8x32xi1>, vector<8x32xf32>
    %c40_103 = arith.constant 40 : index
    %c0_104 = arith.constant 0 : index
    %295 = vector.load %arg19[%c40_103, %c0_104] : memref<64x32xf32, #tpu.memory_space<vmem>>, vector<8x32xf32>
    tpu.vector_store %arg19[%c40_103, %c0_104], %291 {strides = array<i32>} : memref<64x32xf32, #tpu.memory_space<vmem>>, vector<8x32xf32>,
    %c16_105 = arith.constant 16 : index
    %c0_106 = arith.constant 0 : index
    %296 = vector.load %arg20[%c16_105, %c0_106] : memref<64x32xf32, #tpu.memory_space<vmem>>, vector<8x32xf32>
    tpu.vector_store %arg20[%c16_105, %c0_106], %293 {strides = array<i32>} : memref<64x32xf32, #tpu.memory_space<vmem>>, vector<8x32xf32>,
    %c48_107 = arith.constant 48 : index
    %c0_108 = arith.constant 0 : index
    %297 = vector.load %arg17[%c48_107, %c0_108] : memref<64x128xf32, #tpu.memory_space<vmem>>, vector<8x128xf32>
    %cst_109 = arith.constant dense<0.000000e+00> : vector<8x128xf32>
    %298 = tpu.matmul %291, %13, %cst_109 {dimension_numbers = #tpu.dot_dimension_numbers<[1], [0], [0], [1], [0, 0, 1, 1], [], []>} : vector<8x32xf32>, vector<32x128xf32>, vector<8x128xf32> -> vector<8x128xf32>
    %299 = arith.addf %297, %298 : vector<8x128xf32>
    %c8_110 = arith.constant 8 : index
    %c0_111 = arith.constant 0 : index
    %300 = vector.load %arg18[%c8_110, %c0_111] : memref<64x128xf32, #tpu.memory_space<vmem>>, vector<8x128xf32>
    %cst_112 = arith.constant dense<0.000000e+00> : vector<8x128xf32>
    %301 = tpu.matmul %293, %14, %cst_112 {dimension_numbers = #tpu.dot_dimension_numbers<[1], [0], [0], [1], [0, 0, 1, 1], [], []>} : vector<8x32xf32>, vector<32x128xf32>, vector<8x128xf32> -> vector<8x128xf32>
    %302 = arith.addf %300, %301 : vector<8x128xf32>
    %303 = arith.negf %299 : vector<8x128xf32>
    %304 = math.exp %303 : vector<8x128xf32>
    %cst_113 = arith.constant 1.000000e+00 : f32
    %305 = vector.broadcast %cst_113 : f32 to vector<8x128xf32>
    %306 = arith.addf %305, %304 : vector<8x128xf32>
    %307 = arith.divf %305, %306 : vector<8x128xf32>
    %308 = vector.extract_strided_slice %299 {offsets = [0, 64], sizes = [8, 32], strides = [1, 1]} : vector<8x128xf32> to vector<8x32xf32>
    %309 = math.tanh %308 : vector<8x32xf32>
    %310 = vector.extract_strided_slice %307 {offsets = [0, 0], sizes = [8, 32], strides = [1, 1]} : vector<8x128xf32> to vector<8x32xf32>
    %311 = vector.extract_strided_slice %307 {offsets = [0, 32], sizes = [8, 32], strides = [1, 1]} : vector<8x128xf32> to vector<8x32xf32>
    %312 = vector.extract_strided_slice %307 {offsets = [0, 96], sizes = [8, 32], strides = [1, 1]} : vector<8x128xf32> to vector<8x32xf32>
    %313 = arith.mulf %311, %292 : vector<8x32xf32>
    %314 = arith.mulf %310, %309 : vector<8x32xf32>
    %315 = arith.addf %313, %314 : vector<8x32xf32>
    %316 = math.tanh %315 : vector<8x32xf32>
    %317 = arith.mulf %312, %316 : vector<8x32xf32>
    %318 = arith.negf %302 : vector<8x128xf32>
    %319 = math.exp %318 : vector<8x128xf32>
    %cst_114 = arith.constant 1.000000e+00 : f32
    %320 = vector.broadcast %cst_114 : f32 to vector<8x128xf32>
    %321 = arith.addf %320, %319 : vector<8x128xf32>
    %322 = arith.divf %320, %321 : vector<8x128xf32>
    %323 = vector.extract_strided_slice %302 {offsets = [0, 64], sizes = [8, 32], strides = [1, 1]} : vector<8x128xf32> to vector<8x32xf32>
    %324 = math.tanh %323 : vector<8x32xf32>
    %325 = vector.extract_strided_slice %322 {offsets = [0, 0], sizes = [8, 32], strides = [1, 1]} : vector<8x128xf32> to vector<8x32xf32>
    %326 = vector.extract_strided_slice %322 {offsets = [0, 32], sizes = [8, 32], strides = [1, 1]} : vector<8x128xf32> to vector<8x32xf32>
    %327 = vector.extract_strided_slice %322 {offsets = [0, 96], sizes = [8, 32], strides = [1, 1]} : vector<8x128xf32> to vector<8x32xf32>
    %328 = arith.mulf %326, %294 : vector<8x32xf32>
    %329 = arith.mulf %325, %324 : vector<8x32xf32>
    %330 = arith.addf %328, %329 : vector<8x32xf32>
    %331 = math.tanh %330 : vector<8x32xf32>
    %332 = arith.mulf %327, %331 : vector<8x32xf32>
    %cst_115 = arith.constant 6.000000e+00 : f32
    %333 = vector.broadcast %cst_115 : f32 to vector<8x32xf32>
    %334 = arith.cmpf ogt, %15, %333 : vector<8x32xf32>
    %cst_116 = arith.constant 6.000000e+00 : f32
    %335 = vector.broadcast %cst_116 : f32 to vector<8x32xf32>
    %336 = arith.cmpf ole, %16, %335 : vector<8x32xf32>
    %337 = arith.select %334, %317, %291 : vector<8x32xi1>, vector<8x32xf32>
    %338 = arith.select %334, %315, %292 : vector<8x32xi1>, vector<8x32xf32>
    %339 = arith.select %336, %332, %293 : vector<8x32xi1>, vector<8x32xf32>
    %340 = arith.select %336, %330, %294 : vector<8x32xi1>, vector<8x32xf32>
    %c48_117 = arith.constant 48 : index
    %c0_118 = arith.constant 0 : index
    %341 = vector.load %arg19[%c48_117, %c0_118] : memref<64x32xf32, #tpu.memory_space<vmem>>, vector<8x32xf32>
    tpu.vector_store %arg19[%c48_117, %c0_118], %337 {strides = array<i32>} : memref<64x32xf32, #tpu.memory_space<vmem>>, vector<8x32xf32>,
    %c8_119 = arith.constant 8 : index
    %c0_120 = arith.constant 0 : index
    %342 = vector.load %arg20[%c8_119, %c0_120] : memref<64x32xf32, #tpu.memory_space<vmem>>, vector<8x32xf32>
    tpu.vector_store %arg20[%c8_119, %c0_120], %339 {strides = array<i32>} : memref<64x32xf32, #tpu.memory_space<vmem>>, vector<8x32xf32>,
    %c56_121 = arith.constant 56 : index
    %c0_122 = arith.constant 0 : index
    %343 = vector.load %arg17[%c56_121, %c0_122] : memref<64x128xf32, #tpu.memory_space<vmem>>, vector<8x128xf32>
    %cst_123 = arith.constant dense<0.000000e+00> : vector<8x128xf32>
    %344 = tpu.matmul %337, %13, %cst_123 {dimension_numbers = #tpu.dot_dimension_numbers<[1], [0], [0], [1], [0, 0, 1, 1], [], []>} : vector<8x32xf32>, vector<32x128xf32>, vector<8x128xf32> -> vector<8x128xf32>
    %345 = arith.addf %343, %344 : vector<8x128xf32>
    %c0_124 = arith.constant 0 : index
    %c0_125 = arith.constant 0 : index
    %346 = vector.load %arg18[%c0_124, %c0_125] : memref<64x128xf32, #tpu.memory_space<vmem>>, vector<8x128xf32>
    %cst_126 = arith.constant dense<0.000000e+00> : vector<8x128xf32>
    %347 = tpu.matmul %339, %14, %cst_126 {dimension_numbers = #tpu.dot_dimension_numbers<[1], [0], [0], [1], [0, 0, 1, 1], [], []>} : vector<8x32xf32>, vector<32x128xf32>, vector<8x128xf32> -> vector<8x128xf32>
    %348 = arith.addf %346, %347 : vector<8x128xf32>
    %349 = arith.negf %345 : vector<8x128xf32>
    %350 = math.exp %349 : vector<8x128xf32>
    %cst_127 = arith.constant 1.000000e+00 : f32
    %351 = vector.broadcast %cst_127 : f32 to vector<8x128xf32>
    %352 = arith.addf %351, %350 : vector<8x128xf32>
    %353 = arith.divf %351, %352 : vector<8x128xf32>
    %354 = vector.extract_strided_slice %345 {offsets = [0, 64], sizes = [8, 32], strides = [1, 1]} : vector<8x128xf32> to vector<8x32xf32>
    %355 = math.tanh %354 : vector<8x32xf32>
    %356 = vector.extract_strided_slice %353 {offsets = [0, 0], sizes = [8, 32], strides = [1, 1]} : vector<8x128xf32> to vector<8x32xf32>
    %357 = vector.extract_strided_slice %353 {offsets = [0, 32], sizes = [8, 32], strides = [1, 1]} : vector<8x128xf32> to vector<8x32xf32>
    %358 = vector.extract_strided_slice %353 {offsets = [0, 96], sizes = [8, 32], strides = [1, 1]} : vector<8x128xf32> to vector<8x32xf32>
    %359 = arith.mulf %357, %338 : vector<8x32xf32>
    %360 = arith.mulf %356, %355 : vector<8x32xf32>
    %361 = arith.addf %359, %360 : vector<8x32xf32>
    %362 = math.tanh %361 : vector<8x32xf32>
    %363 = arith.mulf %358, %362 : vector<8x32xf32>
    %364 = arith.negf %348 : vector<8x128xf32>
    %365 = math.exp %364 : vector<8x128xf32>
    %cst_128 = arith.constant 1.000000e+00 : f32
    %366 = vector.broadcast %cst_128 : f32 to vector<8x128xf32>
    %367 = arith.addf %366, %365 : vector<8x128xf32>
    %368 = arith.divf %366, %367 : vector<8x128xf32>
    %369 = vector.extract_strided_slice %348 {offsets = [0, 64], sizes = [8, 32], strides = [1, 1]} : vector<8x128xf32> to vector<8x32xf32>
    %370 = math.tanh %369 : vector<8x32xf32>
    %371 = vector.extract_strided_slice %368 {offsets = [0, 0], sizes = [8, 32], strides = [1, 1]} : vector<8x128xf32> to vector<8x32xf32>
    %372 = vector.extract_strided_slice %368 {offsets = [0, 32], sizes = [8, 32], strides = [1, 1]} : vector<8x128xf32> to vector<8x32xf32>
    %373 = vector.extract_strided_slice %368 {offsets = [0, 96], sizes = [8, 32], strides = [1, 1]} : vector<8x128xf32> to vector<8x32xf32>
    %374 = arith.mulf %372, %340 : vector<8x32xf32>
    %375 = arith.mulf %371, %370 : vector<8x32xf32>
    %376 = arith.addf %374, %375 : vector<8x32xf32>
    %377 = math.tanh %376 : vector<8x32xf32>
    %378 = arith.mulf %373, %377 : vector<8x32xf32>
    %cst_129 = arith.constant 7.000000e+00 : f32
    %379 = vector.broadcast %cst_129 : f32 to vector<8x32xf32>
    %380 = arith.cmpf ogt, %15, %379 : vector<8x32xf32>
    %cst_130 = arith.constant 7.000000e+00 : f32
    %381 = vector.broadcast %cst_130 : f32 to vector<8x32xf32>
    %382 = arith.cmpf ole, %16, %381 : vector<8x32xf32>
    %383 = arith.select %380, %363, %337 : vector<8x32xi1>, vector<8x32xf32>
    %384 = arith.select %380, %361, %338 : vector<8x32xi1>, vector<8x32xf32>
    %385 = arith.select %382, %378, %339 : vector<8x32xi1>, vector<8x32xf32>
    %386 = arith.select %382, %376, %340 : vector<8x32xi1>, vector<8x32xf32>
    %c56_131 = arith.constant 56 : index
    %c0_132 = arith.constant 0 : index
    %387 = vector.load %arg19[%c56_131, %c0_132] : memref<64x32xf32, #tpu.memory_space<vmem>>, vector<8x32xf32>
    tpu.vector_store %arg19[%c56_131, %c0_132], %383 {strides = array<i32>} : memref<64x32xf32, #tpu.memory_space<vmem>>, vector<8x32xf32>,
    %c0_133 = arith.constant 0 : index
    %c0_134 = arith.constant 0 : index
    %388 = vector.load %arg20[%c0_133, %c0_134] : memref<64x32xf32, #tpu.memory_space<vmem>>, vector<8x32xf32>
    tpu.vector_store %arg20[%c0_133, %c0_134], %385 {strides = array<i32>} : memref<64x32xf32, #tpu.memory_space<vmem>>, vector<8x32xf32>,
    %c0_135 = arith.constant 0 : index
    %c0_136 = arith.constant 0 : index
    %389 = vector.load %arg15[%c0_135, %c0_136] : memref<16x32xf32, #tpu.memory_space<vmem>>, vector<8x32xf32>
    tpu.vector_store %arg15[%c0_135, %c0_136], %383 {strides = array<i32>} : memref<16x32xf32, #tpu.memory_space<vmem>>, vector<8x32xf32>,
    %c8_137 = arith.constant 8 : index
    %c0_138 = arith.constant 0 : index
    %390 = vector.load %arg15[%c8_137, %c0_138] : memref<16x32xf32, #tpu.memory_space<vmem>>, vector<8x32xf32>
    tpu.vector_store %arg15[%c8_137, %c0_138], %385 {strides = array<i32>} : memref<16x32xf32, #tpu.memory_space<vmem>>, vector<8x32xf32>,
    %c0_139 = arith.constant 0 : index
    %c0_140 = arith.constant 0 : index
    %391 = vector.load %arg16[%c0_139, %c0_140] : memref<16x32xf32, #tpu.memory_space<vmem>>, vector<8x32xf32>
    tpu.vector_store %arg16[%c0_139, %c0_140], %384 {strides = array<i32>} : memref<16x32xf32, #tpu.memory_space<vmem>>, vector<8x32xf32>,
    %c8_141 = arith.constant 8 : index
    %c0_142 = arith.constant 0 : index
    %392 = vector.load %arg16[%c8_141, %c0_142] : memref<16x32xf32, #tpu.memory_space<vmem>>, vector<8x32xf32>
    tpu.vector_store %arg16[%c8_141, %c0_142], %386 {strides = array<i32>} : memref<16x32xf32, #tpu.memory_space<vmem>>, vector<8x32xf32>,
    %c0_143 = arith.constant 0 : index
    %c0_144 = arith.constant 0 : index
    %393 = vector.load %arg13[%c0_143, %c0_144] : memref<64x1xf32, #tpu.memory_space<vmem>>, vector<64x1xf32>
    %c0_145 = arith.constant 0 : index
    %c0_146 = arith.constant 0 : index
    %394 = vector.load %arg19[%c0_145, %c0_146] : memref<64x32xf32, #tpu.memory_space<vmem>>, vector<64x32xf32>
    %395 = vector.broadcast %393 : vector<64x1xf32> to vector<64x32xf32>
    %396 = arith.mulf %394, %395 : vector<64x32xf32>
    %c0_147 = arith.constant 0 : index
    %c0_148 = arith.constant 0 : index
    %397 = vector.load %arg9[%c0_147, %c0_148] : memref<32x16xf32, #tpu.memory_space<vmem>>, vector<32x16xf32>
    %cst_149 = arith.constant dense<0.000000e+00> : vector<64x16xf32>
    %398 = tpu.matmul %396, %397, %cst_149 {dimension_numbers = #tpu.dot_dimension_numbers<[1], [0], [0], [1], [0, 0, 1, 1], [], []>} : vector<64x32xf32>, vector<32x16xf32>, vector<64x16xf32> -> vector<64x16xf32>
    %c0_150 = arith.constant 0 : index
    %c0_151 = arith.constant 0 : index
    %399 = vector.load %arg20[%c0_150, %c0_151] : memref<64x32xf32, #tpu.memory_space<vmem>>, vector<64x32xf32>
    %400 = vector.broadcast %393 : vector<64x1xf32> to vector<64x32xf32>
    %401 = arith.mulf %399, %400 : vector<64x32xf32>
    %c0_152 = arith.constant 0 : index
    %c0_153 = arith.constant 0 : index
    %402 = vector.load %arg10[%c0_152, %c0_153] : memref<32x16xf32, #tpu.memory_space<vmem>>, vector<32x16xf32>
    %cst_154 = arith.constant dense<0.000000e+00> : vector<64x16xf32>
    %403 = tpu.matmul %401, %402, %cst_154 {dimension_numbers = #tpu.dot_dimension_numbers<[1], [0], [0], [1], [0, 0, 1, 1], [], []>} : vector<64x32xf32>, vector<32x16xf32>, vector<64x16xf32> -> vector<64x16xf32>
    %404 = arith.addf %398, %403 : vector<64x16xf32>
    %c0_155 = arith.constant 0 : index
    %c0_156 = arith.constant 0 : index
    %405 = vector.load %arg11[%c0_155, %c0_156] : memref<1x16xf32, #tpu.memory_space<vmem>>, vector<1x16xf32>
    %406 = vector.broadcast %405 : vector<1x16xf32> to vector<64x16xf32>
    %407 = arith.addf %404, %406 : vector<64x16xf32>
    %c0_157 = arith.constant 0 : index
    %c0_158 = arith.constant 0 : index
    %408 = vector.load %arg14[%c0_157, %c0_158] : memref<64x16xf32, #tpu.memory_space<vmem>>, vector<64x16xf32>
    tpu.vector_store %arg14[%c0_157, %c0_158], %407 {strides = array<i32>} : memref<64x16xf32, #tpu.memory_space<vmem>>, vector<64x16xf32>,
    return
  }
}

</mosaic_0001>

<bundles_post_ra>
// kernel: brnn_forward.1
= control target key start
LH: loop header
LB: loop body
LE: loop exit
PB: predicated region body
PF: predicated region fallthrough
CT: control target
= control target key end

     0   :  { %vm66_vm0 = vcmask 64512   ;;  %v3258_v8 = vmov 0.0|0.0   ;;  %s3259_s25 = smov 32   ;;  %vm3260_vm1 = vmmov 0   ;;  %v3261_v24 = vmov 0.0   ;;  %s4032_s4 = inlined_call_operand.vmem [shape: f32[8,128], index: 4, kind: input, shape index: {}]   ;;  %s4033_s0 = inlined_call_operand.vmem [shape: f32[64,8], index: 0, kind: input, shape index: {}]   ;;  %s4034_s6 = inlined_call_operand.vmem [shape: f32[32,128], index: 6, kind: input, shape index: {}]   ;;  %s4035_s3 = inlined_call_operand.vmem [shape: f32[8,128], index: 3, kind: input, shape index: {}]   ;;  %s4036_s5 = inlined_call_operand.vmem [shape: f32[32,128], index: 5, kind: input, shape index: {}]   ;;  %s4037_s2 = inlined_call_operand.vmem [shape: f32[16,32], index: 2, kind: input, shape index: {}]   ;;  %s4038_s1 = inlined_call_operand.vmem [shape: f32[16,32], index: 1, kind: input, shape index: {}]   ;;  %s4039_s8 = inlined_call_operand.vmem [shape: f32[1,128], index: 8, kind: input, shape index: {}]   ;;  %s4040_s7 = inlined_call_operand.vmem [shape: f32[1,128], index: 7, kind: input, shape index: {}]   ;;  %s4041_s12 = inlined_call_operand.vmem [shape: f32[16,32], index: 12, kind: input, shape index: {}]   ;;  %s4042_s13 = inlined_call_operand.vmem [shape: f32[64,1], index: 13, kind: input, shape index: {}]   ;;  %s4043_s10 = inlined_call_operand.vmem [shape: f32[32,16], index: 10, kind: input, shape index: {}]   ;;  %s4044_s9 = inlined_call_operand.vmem [shape: f32[32,16], index: 9, kind: input, shape index: {}]   ;;  %s4045_s16 = inlined_call_operand.vmem [shape: f32[16,32], index: 16, kind: output, shape index: {2}]   ;;  %s4046_s15 = inlined_call_operand.vmem [shape: f32[16,32], index: 15, kind: output, shape index: {1}]   ;;  %s4047_s11 = inlined_call_operand.vmem [shape: f32[1,16], index: 11, kind: input, shape index: {}]   ;;  %s4048_s14 = inlined_call_operand.vmem [shape: f32[64,16], index: 14, kind: output, shape index: {0}]  }
   0x1   :  { %4049 = sst [smem:[#allocation6_spill]] %s4032_s4  ;;  %v50_v1 = vld [vmem:[%s4033_s0] sm:$0xff]  ;;  %v51_v2 = vld [vmem:[%s4033_s0 + $0x8] sm:$0xff]  ;;  %v52_v7 = vld [vmem:[%s4033_s0 + $0x10] sm:$0xff]  ;;  %vm340_vm2 = vcmask 261120  }
   0x2   :  { %s4050_s23 = sld [smem:[#allocation6_spill]]  ;;  %2771 = vmatprep.mubr.msk.f32.mxu1 %vm66_vm0, %v50_v1  ;;  %v329_v3 = vld [vmem:[%s4034_s6] sm:$0xff]  ;;  %v330_v4 = vld [vmem:[%s4034_s6 + $0x8] sm:$0xff]  ;;  %v331_v9 = vld [vmem:[%s4034_s6 + $0x10] sm:$0xff]  ;;  %2757 = vmatprep.mubr.msk.f32.mxu0 %vm66_vm0, %v50_v1 }
   0x3   :  { %v58_v5 = vld [vmem:[%s4035_s3] sm:$0xff]  ;;  %v3369_v6 = vpack.c.bf16 %v330_v4, %v329_v3  ;;  %v332_v10 = vld [vmem:[%s4034_s6 + $0x18] sm:$0xff]  ;;  %v326_v15 = vld [vmem:[%s4036_s5 + $0x8] sm:$0xff] }
   0x4   :  { %2755 = vmatprep.subr.mxu0 %v58_v5  ;;  %v53_v11 = vld [vmem:[%s4033_s0 + $0x18] sm:$0xff]  ;;  %v3386_v12 = vpack.c.bf16 %v332_v10, %v331_v9  ;;  %v54_v13 = vld [vmem:[%s4033_s0 + $0x20] sm:$0xff]  ;;  %v3404_v16 = vld [vmem:[%s4037_s2 + $0x8] sm:$0xff] }
   0x5   :  { %2756 = vmatpush3.msra.mxu0 %v58_v5  ;;  %v325_v14 = vld [vmem:[%s4036_s5] sm:$0xff]  ;;  %v55_v17 = vld [vmem:[%s4033_s0 + $0x28] sm:$0xff]  ;;  %v56_v19 = vld [vmem:[%s4033_s0 + $0x30] sm:$0xff]  ;;  %526 = vrot.lane.b32.xlu1 %v3404_v16, %s3259_s25 }
   0x6   :  { %2758 = vmatmul.mubr.msk.f32.vlgmr.msra.gmra.mrb[0].mxu0 %vm66_vm0, %v51_v2  ;;  %v3413_v18 = vpack.c.bf16 %v326_v15, %v325_v14  ;;  %2999 = vmatprep.subr.bf16.mxu0 %v3258_v8  ;;  %v327_v20 = vld [vmem:[%s4036_s5 + $0x10] sm:$0xff]  ;;  %v328_v21 = vld [vmem:[%s4036_s5 + $0x18] sm:$0xff]  ;;  %v3447_v25 = vld [vmem:[%s4038_s1 + $0x8] sm:$0xff] }
   0x7   :  { %2760 = vmatprep.mubr.msk.f32.mxu0 %vm66_vm0, %v52_v7  ;;  %v57_v22 = vld [vmem:[%s4033_s0 + $0x38] sm:$0xff]  ;;  %v3436_v23 = vpack.c.bf16 %v328_v21, %v327_v20  ;;  %v3459_v26 = vld [vmem:[%s4038_s1] sm:$0xff] }
   0x8   :  { %v204_v0 = vld [vmem:[%s4050_s23] sm:$0xff]  ;;  %3001 = vmatpush3.bf16.msra.mxu0 %v3413_v18 }
   0x9   :  { %2769 = vmatprep.subr.mxu1 %v204_v0  ;;  %3002 = vmatprep.subr.bf16.mxu0 %v3258_v8  ;;  %v2575_v27 = vld [vmem:[%s4039_s8] ss:$0 sm:$0xff] }
   0xa   :  { %2770 = vmatpush3.msra.mxu1 %v204_v0  ;;  %2761 = vmatmul.mubr.msk.f32.gmra.mrb[2].mxu0 %vm66_vm0, %v53_v11  ;;  %v2566_v31 = vld [vmem:[%s4040_s7] ss:$0 sm:$0xff]  ;;  %s3262_s7 = smov 64  }
   0xb   :  { %2772 = vmatmul.mubr.msk.f32.vlgmr.msra.gmra.mrb[0].mxu1 %vm66_vm0, %v51_v2  ;;  %3005 = vmatprep.subr.bf16.mxu1 %v3258_v8  ;;  %v3514_v5 = vld [vmem:[%s4037_s2] sm:$0xff]  ;;  %s3263_s2 = smov 96  }
   0xc   :  { %3007 = vmatpush3.bf16.msra.mxu1 %v3369_v6  ;;  %2774 = vmatprep.mubr.msk.f32.mxu1 %vm66_vm0, %v52_v7 }
   0xd   :  { %3008 = vmatprep.subr.bf16.mxu1 %v3258_v8  ;;  %2763 = vmatprep.mubr.msk.f32.mxu0 %vm66_vm0, %v54_v13 }
   0xe   :  { %2764 = vmatmul.mubr.msk.f32.gmra.mrb[4].mxu0 %vm66_vm0, %v55_v17 }
   0xf   :  { %2775 = vmatmul.mubr.msk.f32.gmra.mrb[2].mxu1 %vm66_vm0, %v53_v11  ;;  %2766 = vmatprep.mubr.msk.f32.mxu0 %vm66_vm0, %v56_v19 }
  0x10   :  { %2777 = vmatprep.mubr.msk.f32.mxu1 %vm66_vm0, %v54_v13  ;;  %3010 = vmatpush3.bf16.msra.mxu1 %v3386_v12 }
  0x11   :  { %3017 = vmatprep.subr.bf16.mxu1 %v3258_v8  ;;  %3004 = vmatpush3.bf16.msra.mxu0 %v3436_v23 }
  0x12   :  { %3011 = vmatprep.subr.bf16.mxu0 %v3258_v8  ;;  %2767 = vmatmul.mubr.msk.f32.gmra.mrb[6].mxu0 %vm66_vm0, %v57_v22 }
  0x13   :  { %2778 = vmatmul.mubr.msk.f32.gmra.mrb[4].mxu1 %vm66_vm0, %v55_v17  ;;  %2791 = vmatprep.mubr.msk.f32.mxu0 %vm3260_vm1, %v3261_v24 }
  0x14   :  { %2780 = vmatprep.mubr.msk.f32.mxu1 %vm66_vm0, %v56_v19 }
  0x16   :  { %2792 = vmatmul.mubr.msk.f32.vlgmr.msra.gmra.mrb[8].mxu0 %vm340_vm2, %v3459_v26 }
  0x17   :  { %2781 = vmatmul.mubr.msk.f32.gmra.mrb[6].mxu1 %vm66_vm0, %v57_v22  ;;  %3013 = vmatpush3.bf16.msra.mxu0 %v3413_v18 }
  0x18   :  { %2802 = vmatprep.mubr.msk.f32.mxu1 %vm3260_vm1, %v3261_v24  ;;  %2813 = vmatprep.mubr.msk.f32.mxu0 %vm3260_vm1, %v3261_v24 }
  0x19   :  { %3014 = vmatprep.subr.bf16.mxu0 %v3258_v8 }
  0x1b   :  { %2803 = vmatmul.mubr.msk.f32.vlgmr.msra.gmra.mrb[8].mxu1 %vm340_vm2, %v3447_v25  ;;  %3016 = vmatpush3.bf16.msra.mxu0 %v3436_v23 }
  0x1c   :  { %3019 = vmatpush3.bf16.msra.mxu1 %v3369_v6  ;;  %2824 = vmatprep.mubr.msk.f32.mxu1 %vm3260_vm1, %v3261_v24 }
  0x1d   :  { %3020 = vmatprep.subr.bf16.mxu1 %v3258_v8  ;;  %3023 = vmatprep.subr.bf16.mxu0 %v3258_v8 }
  0x20   :  { %3022 = vmatpush3.bf16.msra.mxu1 %v3386_v12 }
  0x21   :  { %3029 = vmatprep.subr.bf16.mxu1 %v3258_v8 }
  0xd9   :  { %v2759_v33 = vpop.f32.mrb[0].mxu0 }
  0xda   :  { %v3485_v35 = vadd.f32 %v2759_v33, %v2566_v31  ;;  %v157_v36 = vpop.f32.mrb[1].mxu0 }
  0xdb   :  { %v158_v57 = vadd.f32 %v2566_v31, %v157_v36 }
  0xdd   :  { %v2762_v40 = vpop.f32.mrb[2].mxu0 }
  0xde   :  { %v2773_v28 = vpop.f32.mrb[0].mxu1  ;;  %v3491_v42 = vadd.f32 %v2762_v40, %v2566_v31  ;;  %v167_v43 = vpop.f32.mrb[3].mxu0 }
  0xdf   :  { %v3478_v29 = vadd.f32 %v2773_v28, %v2575_v27  ;;  %v278_v30 = vpop.f32.mrb[1].mxu1  ;;  %v3495_v46 = vadd.f32 %v2566_v31, %v167_v43 }
  0xe0   :  { %v3483_v32 = vadd.f32 %v2575_v27, %v278_v30 }
  0xe1   :  { %v2765_v48 = vpop.f32.mrb[4].mxu0 }
  0xe2   :  { %v2776_v34 = vpop.f32.mrb[2].mxu1  ;;  %v3499_v50 = vadd.f32 %v2765_v48, %v2566_v31  ;;  %v177_v51 = vpop.f32.mrb[5].mxu0 }
  0xe3   :  { %v3487_v37 = vadd.f32 %v2776_v34, %v2575_v27  ;;  %v288_v38 = vpop.f32.mrb[3].mxu1  ;;  %v3501_v53 = vadd.f32 %v2566_v31, %v177_v51  ;;  %v3529_v51 = vld [vmem:[%s4041_s12 + $0x8] sm:$0xff] }
  0xe4   :  { %v3489_v39 = vadd.f32 %v2575_v27, %v288_v38  ;;  %vm547_vm3 = vcmp.le.f32.partialorder %v3529_v51, 0.0  ;;  %vm777_vm5 = vcmp.le.f32.partialorder %v3529_v51, 1.0  ;;  %vm1007_vm7 = vcmp.le.f32.partialorder %v3529_v51, 2.0 }
  0xe5   :  { %v2768_v56 = vpop.f32.mrb[6].mxu0  ;;  %vm1237_vm9 = vcmp.le.f32.partialorder %v3529_v51, 3.0  ;;  %vm1467_vm11 = vcmp.le.f32.partialorder %v3529_v51, 4.0  ;;  %vm1697_vm13 = vcmp.le.f32.partialorder %v3529_v51, 5.0  ;;  %vm1927_vm15 = vcmp.le.f32.partialorder %v3529_v51, 6.0 }
  0xe6   :  { %v2779_v41 = vpop.f32.mrb[4].mxu1  ;;  %v3505_v59 = vadd.f32 %v2768_v56, %v2566_v31  ;;  %v187_v60 = vpop.f32.mrb[7].mxu0 }
  0xe7   :  { %v3493_v44 = vadd.f32 %v2779_v41, %v2575_v27  ;;  %v298_v45 = vpop.f32.mrb[5].mxu1  ;;  %v3507_v63 = vadd.f32 %v2566_v31, %v187_v60 }
  0xe8   :  { %v3497_v47 = vadd.f32 %v2575_v27, %v298_v45 }
  0xe9   :  { %v410_v0 = vpop.f32.mrb[8].mxu0 }
  0xea   :  { %v2782_v49 = vpop.f32.mrb[6].mxu1  ;;  %v414_v1 = vadd.f32 %v410_v0, %v158_v57  ;;  %v2793_v2 = vpop.f32.mrb[9].mxu0 }
  0xeb   :  { %v308_v52 = vpop.f32.mrb[7].mxu1  ;;  %v314_v55 = vadd.f32 %v2782_v49, %v2575_v27 }
  0xec   :  { %v3503_v54 = vadd.f32 %v2575_v27, %v308_v52  ;;  %v2586_v9 = vmul.f32 -1.442695, %v414_v1  ;;  %v527_v27 = vpop.permute.xlu1 %526  ;;  %v3535_v52 = vld [vmem:[%s4041_s12] sm:$0xff] }
  0xed   :  { %vm546_vm4 = vcmp.gt.f32.partialorder %v3535_v52, 0.0  ;;  %vm776_vm6 = vcmp.gt.f32.partialorder %v3535_v52, 1.0  ;;  %vm1006_vm8 = vcmp.gt.f32.partialorder %v3535_v52, 2.0  ;;  %vm1236_vm10 = vcmp.gt.f32.partialorder %v3535_v52, 3.0 }
  0xee   :  { %v485_v58 = vpop.f32.mrb[8].mxu1  ;;  %vm1466_vm12 = vcmp.gt.f32.partialorder %v3535_v52, 4.0  ;;  %vm1696_vm14 = vcmp.gt.f32.partialorder %v3535_v52, 5.0  ;;  %vm1926_vm0 = vcmp.gt.f32.partialorder %v3535_v52, 6.0 }
  0xef   :  { %v489_v61 = vadd.f32 %v485_v58, %v314_v55  ;;  %v2804_v62 = vpop.f32.mrb[9].mxu1 }
  0xf1   :  { %3128 = vtanh.f32 %v489_v61  ;;  %v2587_v7 = vmul.f32 -1.442695, %v489_v61 }
  0xf2   :  { %3130 = vtanh.f32 %v414_v1 }
  0xf3   :  { %3132 = vpow2.f32 %v2587_v7 }
  0xf4   :  { %3134 = vpow2.f32 %v2586_v9 }
  0xfb   :  { %v3129_v3 = vpop.eup %3128 }
  0xfc   :  { %531 = vrot.lane.b32.xlu0 %v3129_v3, %s3262_s7  ;;  %v3131_v4 = vpop.eup %3130 }
  0xfd   :  { %v3133_v10 = vpop.eup %3132 }
  0xfe   :  { %v521_v11 = vadd.f32 1.0, %v3133_v10  ;;  %v3135_v13 = vpop.eup %3134 }
  0xff   :  { %v493_v14 = vadd.f32 1.0, %v3135_v13 }
 0x100   :  { %503 = vrot.lane.b32.xlu0 %v3131_v4, %s3262_s7  ;;  %3136 = vrcp.f32 %v521_v11 }
 0x101   :  { %3138 = vrcp.f32 %v493_v14 }
 0x104   :  { %498 = vrot.lane.b32.xlu0 %v3514_v5, %s3259_s25 }
 0x10a   :  { %v3137_v15 = vpop.eup %3136 }
 0x10b   :  { %v3139_v20 = vpop.eup %3138  ;;  %v529_v28 = vmul.f32 %v3137_v15, %v527_v27 }
 0x16e   :  { %v532_v17 = vpop.permute.xlu0 %531 }
 0x16f   :  { %v534_v19 = vmul.f32 %v3137_v15, %v532_v17 }
 0x171   :  { %536 = vrot.lane.b32.xlu1 %v534_v19, %s3259_s25 }
 0x172   :  { %v504_v21 = vpop.permute.xlu0 %503 }
 0x173   :  { %v506_v22 = vmul.f32 %v3139_v20, %v504_v21 }
 0x175   :  { %508 = vrot.lane.b32.xlu1 %v506_v22, %s3259_s25 }
 0x176   :  { %v499_v30 = vpop.permute.xlu0 %498 }
 0x177   :  { %v501_v34 = vmul.f32 %v3139_v20, %v499_v30 }
 0x1e3   :  { %v537_v31 = vpop.permute.xlu1 %536 }
 0x1e4   :  { %v539_v33 = vadd.f32 %v537_v31, %v529_v28 }
 0x1e6   :  { %3140 = vtanh.f32 %v539_v33 }
 0x1e7   :  { %v509_v36 = vpop.permute.xlu1 %508 }
 0x1e8   :  { %v511_v38 = vadd.f32 %v509_v36, %v501_v34 }
 0x1ea   :  { %3142 = vtanh.f32 %v511_v38 }
 0x1f0   :  { %v3141_v40 = vpop.eup %3140 }
 0x1f1   :  { %542 = vrot.lane.b32.xlu0 %v3141_v40, %s3262_s7 }
 0x1f4   :  { %v3143_v41 = vpop.eup %3142 }
 0x1f5   :  { %514 = vrot.lane.b32.xlu1 %v3143_v41, %s3262_s7 }
 0x263   :  { %v543_v43 = vpop.permute.xlu0 %542 }
 0x264   :  { %v545_v45 = vmul.f32 %v3137_v15, %v543_v43 }
 0x266   :  { %559 = vrot.lane.b32.xlu0 %v545_v45, %s3259_s25 }
 0x267   :  { %v515_v48 = vpop.permute.xlu1 %514 }
 0x268   :  { %v517_v49 = vmul.f32 %v3139_v20, %v515_v48 }
 0x26a   :  { %564 = vrot.lane.b32.xlu0 %v539_v33, %s3263_s2  ;;  %549 = vrot.lane.b32.xlu1 %v517_v49, %s3259_s25 }
 0x26e   :  { %554 = vrot.lane.b32.xlu0 %v511_v38, %s3263_s2 }
 0x2d8   :  { %v560_v55 = vpop.permute.xlu0 %559 }
 0x2d9   :  { %v3538_v56 = vsel %vm547_vm3, %v560_v55, %v3447_v25 }
 0x2da   :  { %569 = vst.msk [vmem:[#allocation5 + $0x38] sm:$0xff] %vm340_vm2, %v3538_v56  ;;  %2825 = vmatmul.mubr.msk.f32.vlgmr.msra.gmra.mrb[10].mxu1 %vm340_vm2, %v3538_v56 }
 0x2db   :  { %3031 = vmatpush3.bf16.msra.mxu1 %v3369_v6  ;;  %2846 = vmatprep.mubr.msk.f32.mxu1 %vm3260_vm1, %v3261_v24 }
 0x2dc   :  { %v565_v57 = vpop.permute.xlu0 %564  ;;  %v550_v58 = vpop.permute.xlu1 %549  ;;  %3032 = vmatprep.subr.bf16.mxu1 %v3258_v8 }
 0x2dd   :  { %v3552_v25 = vsel %vm546_vm4, %v550_v58, %v3459_v26  ;;  %v3555_v60 = vsel %vm547_vm3, %v565_v57, %v3404_v16 }
 0x2de   :  { %568 = vst.msk [vmem:[#allocation4] sm:$0xff] %vm340_vm2, %v3552_v25  ;;  %756 = vrot.lane.b32.xlu0 %v3555_v60, %s3259_s25  ;;  %2814 = vmatmul.mubr.msk.f32.vlgmr.msra.gmra.mrb[10].mxu0 %vm340_vm2, %v3552_v25 }
 0x2df   :  { %3025 = vmatpush3.bf16.msra.mxu0 %v3413_v18  ;;  %3034 = vmatpush3.bf16.msra.mxu1 %v3386_v12 }
 0x2e0   :  { %v555_v61 = vpop.permute.xlu0 %554  ;;  %3026 = vmatprep.subr.bf16.mxu0 %v3258_v8  ;;  %2835 = vmatprep.mubr.msk.f32.mxu0 %vm3260_vm1, %v3261_v24 }
 0x2e1   :  { %v3571_v16 = vsel %vm546_vm4, %v555_v61, %v3514_v5  ;;  %3041 = vmatprep.subr.bf16.mxu1 %v3258_v8  ;;  %vm2545_vm4 = vcmask 130048  }
 0x2e2   :  { %728 = vrot.lane.b32.xlu0 %v3571_v16, %s3259_s25 }
 0x2e3   :  { %3028 = vmatpush3.bf16.msra.mxu0 %v3436_v23 }
 0x2e4   :  { %3035 = vmatprep.subr.bf16.mxu0 %v3258_v8 }
 0x350   :  { %v757_v21 = vpop.permute.xlu0 %756 }
 0x354   :  { %v729_v30 = vpop.permute.xlu0 %728 }
 0x3ad   :  { %v715_v26 = vpop.f32.mrb[10].mxu1 }
 0x3ae   :  { %v719_v62 = vadd.f32 %v715_v26, %v3503_v54  ;;  %v2826_v0 = vpop.f32.mrb[11].mxu1 }
 0x3b0   :  { %3144 = vtanh.f32 %v719_v62  ;;  %v2591_v7 = vmul.f32 -1.442695, %v719_v62 }
 0x3b1   :  { %v640_v1 = vpop.f32.mrb[10].mxu0 }
 0x3b2   :  { %v644_v2 = vadd.f32 %v640_v1, %v3485_v35  ;;  %v2815_v3 = vpop.f32.mrb[11].mxu0 }
 0x3b4   :  { %3146 = vtanh.f32 %v644_v2  ;;  %v2590_v9 = vmul.f32 -1.442695, %v644_v2 }
 0x3b5   :  { %3148 = vpow2.f32 %v2591_v7 }
 0x3b6   :  { %3150 = vpow2.f32 %v2590_v9 }
 0x3ba   :  { %v3145_v4 = vpop.eup %3144 }
 0x3bb   :  { %761 = vrot.lane.b32.xlu1 %v3145_v4, %s3262_s7 }
 0x3be   :  { %v3147_v5 = vpop.eup %3146 }
 0x3bf   :  { %733 = vrot.lane.b32.xlu1 %v3147_v5, %s3262_s7  ;;  %v3149_v10 = vpop.eup %3148 }
 0x3c0   :  { %v751_v11 = vadd.f32 1.0, %v3149_v10  ;;  %v3151_v54 = vpop.eup %3150 }
 0x3c1   :  { %v723_v13 = vadd.f32 1.0, %v3151_v54 }
 0x3c2   :  { %3152 = vrcp.f32 %v751_v11 }
 0x3c3   :  { %3154 = vrcp.f32 %v723_v13 }
 0x3cc   :  { %v3153_v14 = vpop.eup %3152 }
 0x3cd   :  { %v3155_v17 = vpop.eup %3154  ;;  %v759_v22 = vmul.f32 %v3153_v14, %v757_v21 }
 0x3ce   :  { %v731_v31 = vmul.f32 %v3155_v17, %v729_v30 }
 0x42d   :  { %v762_v35 = vpop.permute.xlu1 %761 }
 0x42e   :  { %v764_v15 = vmul.f32 %v3153_v14, %v762_v35 }
 0x430   :  { %766 = vrot.lane.b32.xlu1 %v764_v15, %s3259_s25 }
 0x431   :  { %v734_v19 = vpop.permute.xlu1 %733 }
 0x432   :  { %v736_v20 = vmul.f32 %v3155_v17, %v734_v19 }
 0x434   :  { %738 = vrot.lane.b32.xlu1 %v736_v20, %s3259_s25 }
 0x4a2   :  { %v767_v27 = vpop.permute.xlu1 %766 }
 0x4a3   :  { %v769_v28 = vadd.f32 %v767_v27, %v759_v22 }
 0x4a5   :  { %3156 = vtanh.f32 %v769_v28 }
 0x4a6   :  { %v739_v33 = vpop.permute.xlu1 %738 }
 0x4a7   :  { %v741_v34 = vadd.f32 %v739_v33, %v731_v31 }
 0x4a9   :  { %3158 = vtanh.f32 %v741_v34 }
 0x4af   :  { %v3157_v36 = vpop.eup %3156 }
 0x4b0   :  { %772 = vrot.lane.b32.xlu0 %v3157_v36, %s3262_s7 }
 0x4b3   :  { %v3159_v38 = vpop.eup %3158 }
 0x4b4   :  { %744 = vrot.lane.b32.xlu1 %v3159_v38, %s3262_s7 }
 0x522   :  { %v773_v40 = vpop.permute.xlu0 %772 }
 0x523   :  { %v775_v41 = vmul.f32 %v3153_v14, %v773_v40 }
 0x525   :  { %789 = vrot.lane.b32.xlu0 %v775_v41, %s3259_s25 }
 0x526   :  { %v745_v43 = vpop.permute.xlu1 %744 }
 0x527   :  { %v747_v45 = vmul.f32 %v3155_v17, %v745_v43 }
 0x529   :  { %794 = vrot.lane.b32.xlu0 %v769_v28, %s3263_s2  ;;  %779 = vrot.lane.b32.xlu1 %v747_v45, %s3259_s25 }
 0x52d   :  { %784 = vrot.lane.b32.xlu0 %v741_v34, %s3263_s2 }
 0x597   :  { %v790_v48 = vpop.permute.xlu0 %789 }
 0x598   :  { %v3592_v49 = vsel %vm777_vm5, %v790_v48, %v3538_v56 }
 0x599   :  { %799 = vst.msk [vmem:[#allocation5 + $0x30] sm:$0xff] %vm340_vm2, %v3592_v49  ;;  %2847 = vmatmul.mubr.msk.f32.vlgmr.msra.gmra.mrb[12].mxu1 %vm340_vm2, %v3592_v49 }
 0x59a   :  { %3043 = vmatpush3.bf16.msra.mxu1 %v3369_v6  ;;  %2868 = vmatprep.mubr.msk.f32.mxu1 %vm3260_vm1, %v3261_v24 }
 0x59b   :  { %v795_v55 = vpop.permute.xlu0 %794  ;;  %v780_v57 = vpop.permute.xlu1 %779  ;;  %3044 = vmatprep.subr.bf16.mxu1 %v3258_v8 }
 0x59c   :  { %v3606_v56 = vsel %vm776_vm6, %v780_v57, %v3552_v25  ;;  %v3609_v58 = vsel %vm777_vm5, %v795_v55, %v3555_v60 }
 0x59d   :  { %798 = vst.msk [vmem:[#allocation4 + $0x8] sm:$0xff] %vm340_vm2, %v3606_v56  ;;  %986 = vrot.lane.b32.xlu0 %v3609_v58, %s3259_s25  ;;  %2836 = vmatmul.mubr.msk.f32.vlgmr.msra.gmra.mrb[12].mxu0 %vm340_vm2, %v3606_v56 }
 0x59e   :  { %3037 = vmatpush3.bf16.msra.mxu0 %v3413_v18  ;;  %3046 = vmatpush3.bf16.msra.mxu1 %v3386_v12 }
 0x59f   :  { %v785_v61 = vpop.permute.xlu0 %784  ;;  %3038 = vmatprep.subr.bf16.mxu0 %v3258_v8  ;;  %2857 = vmatprep.mubr.msk.f32.mxu0 %vm3260_vm1, %v3261_v24 }
 0x5a0   :  { %v3625_v25 = vsel %vm776_vm6, %v785_v61, %v3571_v16  ;;  %3053 = vmatprep.subr.bf16.mxu1 %v3258_v8 }
 0x5a1   :  { %958 = vrot.lane.b32.xlu0 %v3625_v25, %s3259_s25 }
 0x5a2   :  { %3040 = vmatpush3.bf16.msra.mxu0 %v3436_v23 }
 0x5a3   :  { %3047 = vmatprep.subr.bf16.mxu0 %v3258_v8 }
 0x60f   :  { %v987_v15 = vpop.permute.xlu0 %986 }
 0x613   :  { %v959_v21 = vpop.permute.xlu0 %958 }
 0x66c   :  { %v945_v60 = vpop.f32.mrb[12].mxu1 }
 0x66d   :  { %v949_v26 = vadd.f32 %v945_v60, %v3493_v44  ;;  %v2848_v62 = vpop.f32.mrb[13].mxu1 }
 0x66f   :  { %3160 = vtanh.f32 %v949_v26  ;;  %v2595_v4 = vmul.f32 -1.442695, %v949_v26 }
 0x670   :  { %v870_v0 = vpop.f32.mrb[12].mxu0 }
 0x671   :  { %v874_v1 = vadd.f32 %v870_v0, %v3495_v46  ;;  %v2837_v2 = vpop.f32.mrb[13].mxu0 }
 0x673   :  { %3162 = vtanh.f32 %v874_v1  ;;  %v2594_v5 = vmul.f32 -1.442695, %v874_v1 }
 0x674   :  { %3164 = vpow2.f32 %v2595_v4 }
 0x675   :  { %3166 = vpow2.f32 %v2594_v5 }
 0x679   :  { %v3161_v16 = vpop.eup %3160 }
 0x67a   :  { %991 = vrot.lane.b32.xlu1 %v3161_v16, %s3262_s7 }
 0x67d   :  { %v3163_v3 = vpop.eup %3162 }
 0x67e   :  { %963 = vrot.lane.b32.xlu1 %v3163_v3, %s3262_s7  ;;  %v3165_v7 = vpop.eup %3164 }
 0x67f   :  { %v981_v9 = vadd.f32 1.0, %v3165_v7  ;;  %v3167_v44 = vpop.eup %3166 }
 0x680   :  { %v953_v10 = vadd.f32 1.0, %v3167_v44 }
 0x681   :  { %3168 = vrcp.f32 %v981_v9 }
 0x682   :  { %3170 = vrcp.f32 %v953_v10 }
 0x68b   :  { %v3169_v11 = vpop.eup %3168 }
 0x68c   :  { %v3171_v13 = vpop.eup %3170  ;;  %v989_v17 = vmul.f32 %v3169_v11, %v987_v15 }
 0x68d   :  { %v961_v22 = vmul.f32 %v3171_v13, %v959_v21 }
 0x6ec   :  { %v992_v46 = vpop.permute.xlu1 %991 }
 0x6ed   :  { %v994_v54 = vmul.f32 %v3169_v11, %v992_v46 }
 0x6ef   :  { %996 = vrot.lane.b32.xlu1 %v994_v54, %s3259_s25 }
 0x6f0   :  { %v964_v14 = vpop.permute.xlu1 %963 }
 0x6f1   :  { %v966_v35 = vmul.f32 %v3171_v13, %v964_v14 }
 0x6f3   :  { %968 = vrot.lane.b32.xlu1 %v966_v35, %s3259_s25 }
 0x761   :  { %v997_v19 = vpop.permute.xlu1 %996 }
 0x762   :  { %v999_v20 = vadd.f32 %v997_v19, %v989_v17 }
 0x764   :  { %3172 = vtanh.f32 %v999_v20 }
 0x765   :  { %v969_v27 = vpop.permute.xlu1 %968 }
 0x766   :  { %v971_v28 = vadd.f32 %v969_v27, %v961_v22 }
 0x768   :  { %3174 = vtanh.f32 %v971_v28 }
 0x76e   :  { %v3173_v30 = vpop.eup %3172 }
 0x76f   :  { %1002 = vrot.lane.b32.xlu0 %v3173_v30, %s3262_s7 }
 0x772   :  { %v3175_v31 = vpop.eup %3174 }
 0x773   :  { %974 = vrot.lane.b32.xlu1 %v3175_v31, %s3262_s7 }
 0x7e1   :  { %v1003_v33 = vpop.permute.xlu0 %1002 }
 0x7e2   :  { %v1005_v34 = vmul.f32 %v3169_v11, %v1003_v33 }
 0x7e4   :  { %1019 = vrot.lane.b32.xlu0 %v1005_v34, %s3259_s25 }
 0x7e5   :  { %v975_v36 = vpop.permute.xlu1 %974 }
 0x7e6   :  { %v977_v38 = vmul.f32 %v3171_v13, %v975_v36 }
 0x7e8   :  { %1024 = vrot.lane.b32.xlu0 %v999_v20, %s3263_s2  ;;  %1009 = vrot.lane.b32.xlu1 %v977_v38, %s3259_s25 }
 0x7ec   :  { %1014 = vrot.lane.b32.xlu0 %v971_v28, %s3263_s2 }
 0x856   :  { %v1020_v40 = vpop.permute.xlu0 %1019 }
 0x857   :  { %v3646_v41 = vsel %vm1007_vm7, %v1020_v40, %v3592_v49 }
 0x858   :  { %1029 = vst.msk [vmem:[#allocation5 + $0x28] sm:$0xff] %vm340_vm2, %v3646_v41  ;;  %2869 = vmatmul.mubr.msk.f32.vlgmr.msra.gmra.mrb[14].mxu1 %vm340_vm2, %v3646_v41 }
 0x859   :  { %3055 = vmatpush3.bf16.msra.mxu1 %v3369_v6  ;;  %2890 = vmatprep.mubr.msk.f32.mxu1 %vm3260_vm1, %v3261_v24 }
 0x85a   :  { %v1025_v43 = vpop.permute.xlu0 %1024  ;;  %v1010_v45 = vpop.permute.xlu1 %1009  ;;  %3056 = vmatprep.subr.bf16.mxu1 %v3258_v8 }
 0x85b   :  { %v3660_v48 = vsel %vm1006_vm8, %v1010_v45, %v3606_v56  ;;  %v3663_v49 = vsel %vm1007_vm7, %v1025_v43, %v3609_v58 }
 0x85c   :  { %1028 = vst.msk [vmem:[#allocation4 + $0x10] sm:$0xff] %vm340_vm2, %v3660_v48  ;;  %1216 = vrot.lane.b32.xlu0 %v3663_v49, %s3259_s25  ;;  %2858 = vmatmul.mubr.msk.f32.vlgmr.msra.gmra.mrb[14].mxu0 %vm340_vm2, %v3660_v48 }
 0x85d   :  { %3049 = vmatpush3.bf16.msra.mxu0 %v3413_v18  ;;  %3058 = vmatpush3.bf16.msra.mxu1 %v3386_v12 }
 0x85e   :  { %v1015_v55 = vpop.permute.xlu0 %1014  ;;  %3050 = vmatprep.subr.bf16.mxu0 %v3258_v8  ;;  %2879 = vmatprep.mubr.msk.f32.mxu0 %vm3260_vm1, %v3261_v24 }
 0x85f   :  { %v3679_v57 = vsel %vm1006_vm8, %v1015_v55, %v3625_v25  ;;  %3065 = vmatprep.subr.bf16.mxu1 %v3258_v8 }
 0x860   :  { %1188 = vrot.lane.b32.xlu0 %v3679_v57, %s3259_s25 }
 0x861   :  { %3052 = vmatpush3.bf16.msra.mxu0 %v3436_v23 }
 0x862   :  { %3059 = vmatprep.subr.bf16.mxu0 %v3258_v8 }
 0x8ce   :  { %v1217_v11 = vpop.permute.xlu0 %1216 }
 0x8d2   :  { %v1189_v14 = vpop.permute.xlu0 %1188 }
 0x92b   :  { %v1175_v56 = vpop.f32.mrb[14].mxu1 }
 0x92c   :  { %v1179_v58 = vadd.f32 %v1175_v56, %v3497_v47  ;;  %v2870_v61 = vpop.f32.mrb[15].mxu1 }
 0x92e   :  { %3176 = vtanh.f32 %v1179_v58  ;;  %v2599_v1 = vmul.f32 -1.442695, %v1179_v58 }
 0x92f   :  { %v1100_v60 = vpop.f32.mrb[14].mxu0 }
 0x930   :  { %v1104_v26 = vadd.f32 %v1100_v60, %v3491_v42  ;;  %v2859_v62 = vpop.f32.mrb[15].mxu0 }
 0x932   :  { %3178 = vtanh.f32 %v1104_v26  ;;  %v2598_v2 = vmul.f32 -1.442695, %v1104_v26 }
 0x933   :  { %3180 = vpow2.f32 %v2599_v1 }
 0x934   :  { %3182 = vpow2.f32 %v2598_v2 }
 0x938   :  { %v3177_v25 = vpop.eup %3176 }
 0x939   :  { %1221 = vrot.lane.b32.xlu1 %v3177_v25, %s3262_s7 }
 0x93c   :  { %v3179_v0 = vpop.eup %3178 }
 0x93d   :  { %1193 = vrot.lane.b32.xlu1 %v3179_v0, %s3262_s7  ;;  %v3181_v16 = vpop.eup %3180 }
 0x93e   :  { %v1211_v3 = vadd.f32 1.0, %v3181_v16  ;;  %v3183_v47 = vpop.eup %3182 }
 0x93f   :  { %v1183_v4 = vadd.f32 1.0, %v3183_v47 }
 0x940   :  { %3184 = vrcp.f32 %v1211_v3 }
 0x941   :  { %3186 = vrcp.f32 %v1183_v4 }
 0x94a   :  { %v3185_v5 = vpop.eup %3184 }
 0x94b   :  { %v3187_v9 = vpop.eup %3186  ;;  %v1219_v46 = vmul.f32 %v3185_v5, %v1217_v11 }
 0x94c   :  { %v1191_v35 = vmul.f32 %v3187_v9, %v1189_v14 }
 0x9ab   :  { %v1222_v42 = vpop.permute.xlu1 %1221 }
 0x9ac   :  { %v1224_v7 = vmul.f32 %v3185_v5, %v1222_v42 }
 0x9ae   :  { %1226 = vrot.lane.b32.xlu1 %v1224_v7, %s3259_s25 }
 0x9af   :  { %v1194_v44 = vpop.permute.xlu1 %1193 }
 0x9b0   :  { %v1196_v10 = vmul.f32 %v3187_v9, %v1194_v44 }
 0x9b2   :  { %1198 = vrot.lane.b32.xlu1 %v1196_v10, %s3259_s25 }
 0xa20   :  { %v1227_v54 = vpop.permute.xlu1 %1226 }
 0xa21   :  { %v1229_v13 = vadd.f32 %v1227_v54, %v1219_v46 }
 0xa23   :  { %3188 = vtanh.f32 %v1229_v13 }
 0xa24   :  { %v1199_v15 = vpop.permute.xlu1 %1198 }
 0xa25   :  { %v1201_v17 = vadd.f32 %v1199_v15, %v1191_v35 }
 0xa27   :  { %3190 = vtanh.f32 %v1201_v17 }
 0xa2d   :  { %v3189_v19 = vpop.eup %3188 }
 0xa2e   :  { %1232 = vrot.lane.b32.xlu0 %v3189_v19, %s3262_s7 }
 0xa31   :  { %v3191_v20 = vpop.eup %3190 }
 0xa32   :  { %1204 = vrot.lane.b32.xlu1 %v3191_v20, %s3262_s7 }
 0xaa0   :  { %v1233_v21 = vpop.permute.xlu0 %1232 }
 0xaa1   :  { %v1235_v22 = vmul.f32 %v3185_v5, %v1233_v21 }
 0xaa3   :  { %1249 = vrot.lane.b32.xlu0 %v1235_v22, %s3259_s25 }
 0xaa4   :  { %v1205_v27 = vpop.permute.xlu1 %1204 }
 0xaa5   :  { %v1207_v28 = vmul.f32 %v3187_v9, %v1205_v27 }
 0xaa7   :  { %1254 = vrot.lane.b32.xlu0 %v1229_v13, %s3263_s2  ;;  %1239 = vrot.lane.b32.xlu1 %v1207_v28, %s3259_s25 }
 0xaab   :  { %1244 = vrot.lane.b32.xlu0 %v1201_v17, %s3263_s2 }
 0xb15   :  { %v1250_v30 = vpop.permute.xlu0 %1249 }
 0xb16   :  { %v3700_v31 = vsel %vm1237_vm9, %v1250_v30, %v3646_v41 }
 0xb17   :  { %1259 = vst.msk [vmem:[#allocation5 + $0x20] sm:$0xff] %vm340_vm2, %v3700_v31  ;;  %2891 = vmatmul.mubr.msk.f32.vlgmr.msra.gmra.mrb[16].mxu1 %vm340_vm2, %v3700_v31 }
 0xb18   :  { %3067 = vmatpush3.bf16.msra.mxu1 %v3369_v6  ;;  %2912 = vmatprep.mubr.msk.f32.mxu1 %vm3260_vm1, %v3261_v24 }
 0xb19   :  { %v1255_v33 = vpop.permute.xlu0 %1254  ;;  %v1240_v34 = vpop.permute.xlu1 %1239  ;;  %3068 = vmatprep.subr.bf16.mxu1 %v3258_v8 }
 0xb1a   :  { %v3714_v36 = vsel %vm1236_vm10, %v1240_v34, %v3660_v48  ;;  %v3717_v38 = vsel %vm1237_vm9, %v1255_v33, %v3663_v49 }
 0xb1b   :  { %1258 = vst.msk [vmem:[#allocation4 + $0x18] sm:$0xff] %vm340_vm2, %v3714_v36  ;;  %1446 = vrot.lane.b32.xlu0 %v3717_v38, %s3259_s25  ;;  %2880 = vmatmul.mubr.msk.f32.vlgmr.msra.gmra.mrb[16].mxu0 %vm340_vm2, %v3714_v36 }
 0xb1c   :  { %3061 = vmatpush3.bf16.msra.mxu0 %v3413_v18  ;;  %3070 = vmatpush3.bf16.msra.mxu1 %v3386_v12 }
 0xb1d   :  { %v1245_v40 = vpop.permute.xlu0 %1244  ;;  %3062 = vmatprep.subr.bf16.mxu0 %v3258_v8  ;;  %2901 = vmatprep.mubr.msk.f32.mxu0 %vm3260_vm1, %v3261_v24 }
 0xb1e   :  { %v3733_v41 = vsel %vm1236_vm10, %v1245_v40, %v3679_v57  ;;  %3077 = vmatprep.subr.bf16.mxu1 %v3258_v8 }
 0xb1f   :  { %1418 = vrot.lane.b32.xlu0 %v3733_v41, %s3259_s25 }
 0xb20   :  { %3064 = vmatpush3.bf16.msra.mxu0 %v3436_v23 }
 0xb21   :  { %3071 = vmatprep.subr.bf16.mxu0 %v3258_v8 }
 0xb8d   :  { %v1447_v47 = vpop.permute.xlu0 %1446 }
 0xb91   :  { %v1419_v7 = vpop.permute.xlu0 %1418 }
 0xbea   :  { %v1405_v43 = vpop.f32.mrb[16].mxu1 }
 0xbeb   :  { %v1409_v45 = vadd.f32 %v1405_v43, %v3487_v37  ;;  %v2892_v48 = vpop.f32.mrb[17].mxu1 }
 0xbed   :  { %3192 = vtanh.f32 %v1409_v45  ;;  %v2603_v61 = vmul.f32 -1.442695, %v1409_v45 }
 0xbee   :  { %v1330_v49 = vpop.f32.mrb[16].mxu0 }
 0xbef   :  { %v1334_v55 = vadd.f32 %v1330_v49, %v3501_v53  ;;  %v2881_v56 = vpop.f32.mrb[17].mxu0 }
 0xbf1   :  { %3194 = vtanh.f32 %v1334_v55  ;;  %v2602_v60 = vmul.f32 -1.442695, %v1334_v55 }
 0xbf2   :  { %3196 = vpow2.f32 %v2603_v61 }
 0xbf3   :  { %3198 = vpow2.f32 %v2602_v60 }
 0xbf7   :  { %v3193_v57 = vpop.eup %3192 }
 0xbf8   :  { %1451 = vrot.lane.b32.xlu1 %v3193_v57, %s3262_s7 }
 0xbfb   :  { %v3195_v58 = vpop.eup %3194 }
 0xbfc   :  { %1423 = vrot.lane.b32.xlu1 %v3195_v58, %s3262_s7  ;;  %v3197_v26 = vpop.eup %3196 }
 0xbfd   :  { %v1441_v62 = vadd.f32 1.0, %v3197_v26  ;;  %v3199_v37 = vpop.eup %3198 }
 0xbfe   :  { %v1413_v25 = vadd.f32 1.0, %v3199_v37 }
 0xbff   :  { %3200 = vrcp.f32 %v1441_v62 }
 0xc00   :  { %3202 = vrcp.f32 %v1413_v25 }
 0xc09   :  { %v3201_v0 = vpop.eup %3200 }
 0xc0a   :  { %v3203_v2 = vpop.eup %3202  ;;  %v1449_v4 = vmul.f32 %v3201_v0, %v1447_v47 }
 0xc0b   :  { %v1421_v9 = vmul.f32 %v3203_v2, %v1419_v7 }
 0xc6a   :  { %v1452_v53 = vpop.permute.xlu1 %1451 }
 0xc6b   :  { %v1454_v1 = vmul.f32 %v3201_v0, %v1452_v53 }
 0xc6d   :  { %1456 = vrot.lane.b32.xlu1 %v1454_v1, %s3259_s25 }
 0xc6e   :  { %v1424_v16 = vpop.permute.xlu1 %1423 }
 0xc6f   :  { %v1426_v3 = vmul.f32 %v3203_v2, %v1424_v16 }
 0xc71   :  { %1428 = vrot.lane.b32.xlu1 %v1426_v3, %s3259_s25 }
 0xcdf   :  { %v1457_v5 = vpop.permute.xlu1 %1456 }
 0xce0   :  { %v1459_v42 = vadd.f32 %v1457_v5, %v1449_v4 }
 0xce2   :  { %3204 = vtanh.f32 %v1459_v42 }
 0xce3   :  { %v1429_v44 = vpop.permute.xlu1 %1428 }
 0xce4   :  { %v1431_v10 = vadd.f32 %v1429_v44, %v1421_v9 }
 0xce6   :  { %3206 = vtanh.f32 %v1431_v10 }
 0xcec   :  { %v3205_v11 = vpop.eup %3204 }
 0xced   :  { %1462 = vrot.lane.b32.xlu0 %v3205_v11, %s3262_s7 }
 0xcf0   :  { %v3207_v46 = vpop.eup %3206 }
 0xcf1   :  { %1434 = vrot.lane.b32.xlu1 %v3207_v46, %s3262_s7 }
 0xd5f   :  { %v1463_v54 = vpop.permute.xlu0 %1462 }
 0xd60   :  { %v1465_v13 = vmul.f32 %v3201_v0, %v1463_v54 }
 0xd62   :  { %1479 = vrot.lane.b32.xlu0 %v1465_v13, %s3259_s25 }
 0xd63   :  { %v1435_v14 = vpop.permute.xlu1 %1434 }
 0xd64   :  { %v1437_v35 = vmul.f32 %v3203_v2, %v1435_v14 }
 0xd66   :  { %1484 = vrot.lane.b32.xlu0 %v1459_v42, %s3263_s2  ;;  %1469 = vrot.lane.b32.xlu1 %v1437_v35, %s3259_s25 }
 0xd6a   :  { %1474 = vrot.lane.b32.xlu0 %v1431_v10, %s3263_s2 }
 0xdd4   :  { %v1480_v15 = vpop.permute.xlu0 %1479 }
 0xdd5   :  { %v3754_v17 = vsel %vm1467_vm11, %v1480_v15, %v3700_v31 }
 0xdd6   :  { %1489 = vst.msk [vmem:[#allocation5 + $0x18] sm:$0xff] %vm340_vm2, %v3754_v17  ;;  %2913 = vmatmul.mubr.msk.f32.vlgmr.msra.gmra.mrb[18].mxu1 %vm340_vm2, %v3754_v17 }
 0xdd7   :  { %3079 = vmatpush3.bf16.msra.mxu1 %v3369_v6  ;;  %2934 = vmatprep.mubr.msk.f32.mxu1 %vm3260_vm1, %v3261_v24 }
 0xdd8   :  { %v1485_v19 = vpop.permute.xlu0 %1484  ;;  %v1470_v20 = vpop.permute.xlu1 %1469  ;;  %3080 = vmatprep.subr.bf16.mxu1 %v3258_v8 }
 0xdd9   :  { %v3768_v21 = vsel %vm1466_vm12, %v1470_v20, %v3714_v36  ;;  %v3771_v22 = vsel %vm1467_vm11, %v1485_v19, %v3717_v38 }
 0xdda   :  { %1488 = vst.msk [vmem:[#allocation4 + $0x20] sm:$0xff] %vm340_vm2, %v3768_v21  ;;  %1676 = vrot.lane.b32.xlu0 %v3771_v22, %s3259_s25  ;;  %2902 = vmatmul.mubr.msk.f32.vlgmr.msra.gmra.mrb[18].mxu0 %vm340_vm2, %v3768_v21 }
 0xddb   :  { %3073 = vmatpush3.bf16.msra.mxu0 %v3413_v18  ;;  %3082 = vmatpush3.bf16.msra.mxu1 %v3386_v12 }
 0xddc   :  { %v1475_v27 = vpop.permute.xlu0 %1474  ;;  %3074 = vmatprep.subr.bf16.mxu0 %v3258_v8  ;;  %2923 = vmatprep.mubr.msk.f32.mxu0 %vm3260_vm1, %v3261_v24 }
 0xddd   :  { %v3787_v28 = vsel %vm1466_vm12, %v1475_v27, %v3733_v41  ;;  %3089 = vmatprep.subr.bf16.mxu1 %v3258_v8 }
 0xdde   :  { %1648 = vrot.lane.b32.xlu0 %v3787_v28, %s3259_s25 }
 0xddf   :  { %3076 = vmatpush3.bf16.msra.mxu0 %v3436_v23 }
 0xde0   :  { %3083 = vmatprep.subr.bf16.mxu0 %v3258_v8 }
 0xe4c   :  { %v1677_v26 = vpop.permute.xlu0 %1676 }
 0xe50   :  { %v1649_v0 = vpop.permute.xlu0 %1648 }
 0xea9   :  { %v1635_v30 = vpop.f32.mrb[18].mxu1 }
 0xeaa   :  { %v1639_v31 = vadd.f32 %v1635_v30, %v3489_v39  ;;  %v2914_v33 = vpop.f32.mrb[19].mxu1 }
 0xeac   :  { %3208 = vtanh.f32 %v1639_v31  ;;  %v2607_v43 = vmul.f32 -1.442695, %v1639_v31 }
 0xead   :  { %v1560_v34 = vpop.f32.mrb[18].mxu0 }
 0xeae   :  { %v1564_v36 = vadd.f32 %v1560_v34, %v3499_v50  ;;  %v2903_v38 = vpop.f32.mrb[19].mxu0 }
 0xeb0   :  { %3210 = vtanh.f32 %v1564_v36  ;;  %v2606_v45 = vmul.f32 -1.442695, %v1564_v36 }
 0xeb1   :  { %3212 = vpow2.f32 %v2607_v43 }
 0xeb2   :  { %3214 = vpow2.f32 %v2606_v45 }
 0xeb6   :  { %v3209_v40 = vpop.eup %3208 }
 0xeb7   :  { %1681 = vrot.lane.b32.xlu1 %v3209_v40, %s3262_s7 }
 0xeba   :  { %v3211_v41 = vpop.eup %3210 }
 0xebb   :  { %1653 = vrot.lane.b32.xlu1 %v3211_v41, %s3262_s7  ;;  %v3213_v48 = vpop.eup %3212 }
 0xebc   :  { %v1671_v49 = vadd.f32 1.0, %v3213_v48  ;;  %v3215_v39 = vpop.eup %3214 }
 0xebd   :  { %v1643_v55 = vadd.f32 1.0, %v3215_v39 }
 0xebe   :  { %3216 = vrcp.f32 %v1671_v49 }
 0xebf   :  { %3218 = vrcp.f32 %v1643_v55 }
 0xec8   :  { %v3217_v56 = vpop.eup %3216 }
 0xec9   :  { %v3219_v58 = vpop.eup %3218  ;;  %v1679_v62 = vmul.f32 %v3217_v56, %v1677_v26 }
 0xeca   :  { %v1651_v53 = vmul.f32 %v3219_v58, %v1649_v0 }
 0xf29   :  { %v1682_v50 = vpop.permute.xlu1 %1681 }
 0xf2a   :  { %v1684_v57 = vmul.f32 %v3217_v56, %v1682_v50 }
 0xf2c   :  { %1686 = vrot.lane.b32.xlu1 %v1684_v57, %s3259_s25 }
 0xf2d   :  { %v1654_v61 = vpop.permute.xlu1 %1653 }
 0xf2e   :  { %v1656_v60 = vmul.f32 %v3219_v58, %v1654_v61 }
 0xf30   :  { %1658 = vrot.lane.b32.xlu1 %v1656_v60, %s3259_s25 }
 0xf9e   :  { %v1687_v37 = vpop.permute.xlu1 %1686 }
 0xf9f   :  { %v1689_v25 = vadd.f32 %v1687_v37, %v1679_v62 }
 0xfa1   :  { %3220 = vtanh.f32 %v1689_v25 }
 0xfa2   :  { %v1659_v1 = vpop.permute.xlu1 %1658 }
 0xfa3   :  { %v1661_v2 = vadd.f32 %v1659_v1, %v1651_v53 }
 0xfa5   :  { %3222 = vtanh.f32 %v1661_v2 }
 0xfab   :  { %v3221_v16 = vpop.eup %3220 }
 0xfac   :  { %1692 = vrot.lane.b32.xlu0 %v3221_v16, %s3262_s7 }
 0xfaf   :  { %v3223_v3 = vpop.eup %3222 }
 0xfb0   :  { %1664 = vrot.lane.b32.xlu1 %v3223_v3, %s3262_s7 }
0x101e   :  { %v1693_v47 = vpop.permute.xlu0 %1692 }
0x101f   :  { %v1695_v4 = vmul.f32 %v3217_v56, %v1693_v47 }
0x1021   :  { %1709 = vrot.lane.b32.xlu0 %v1695_v4, %s3259_s25 }
0x1022   :  { %v1665_v5 = vpop.permute.xlu1 %1664 }
0x1023   :  { %v1667_v42 = vmul.f32 %v3219_v58, %v1665_v5 }
0x1025   :  { %1714 = vrot.lane.b32.xlu0 %v1689_v25, %s3263_s2  ;;  %1699 = vrot.lane.b32.xlu1 %v1667_v42, %s3259_s25 }
0x1029   :  { %1704 = vrot.lane.b32.xlu0 %v1661_v2, %s3263_s2 }
0x1093   :  { %v1710_v7 = vpop.permute.xlu0 %1709 }
0x1094   :  { %v3808_v9 = vsel %vm1697_vm13, %v1710_v7, %v3754_v17 }
0x1095   :  { %1719 = vst.msk [vmem:[#allocation5 + $0x10] sm:$0xff] %vm340_vm2, %v3808_v9  ;;  %2935 = vmatmul.mubr.msk.f32.vlgmr.msra.gmra.mrb[20].mxu1 %vm340_vm2, %v3808_v9 }
0x1096   :  { %3091 = vmatpush3.bf16.msra.mxu1 %v3369_v6  ;;  %2956 = vmatprep.mubr.msk.f32.mxu1 %vm3260_vm1, %v3261_v24 }
0x1097   :  { %v1715_v44 = vpop.permute.xlu0 %1714  ;;  %v1700_v10 = vpop.permute.xlu1 %1699  ;;  %3092 = vmatprep.subr.bf16.mxu1 %v3258_v8 }
0x1098   :  { %v3822_v11 = vsel %vm1696_vm14, %v1700_v10, %v3768_v21  ;;  %v3825_v46 = vsel %vm1697_vm13, %v1715_v44, %v3771_v22 }
0x1099   :  { %1718 = vst.msk [vmem:[#allocation4 + $0x28] sm:$0xff] %vm340_vm2, %v3822_v11  ;;  %1906 = vrot.lane.b32.xlu0 %v3825_v46, %s3259_s25  ;;  %2924 = vmatmul.mubr.msk.f32.vlgmr.msra.gmra.mrb[20].mxu0 %vm340_vm2, %v3822_v11 }
0x109a   :  { %3085 = vmatpush3.bf16.msra.mxu0 %v3413_v18  ;;  %3094 = vmatpush3.bf16.msra.mxu1 %v3386_v12 }
0x109b   :  { %v1705_v6 = vpop.permute.xlu0 %1704  ;;  %3086 = vmatprep.subr.bf16.mxu0 %v3258_v8  ;;  %2945 = vmatprep.mubr.msk.f32.mxu0 %vm3260_vm1, %v3261_v24 }
0x109c   :  { %v3841_v54 = vsel %vm1696_vm14, %v1705_v6, %v3787_v28  ;;  %v3264_v6 = vmov 0  }
0x109d   :  { %1878 = vrot.lane.b32.xlu0 %v3841_v54, %s3259_s25  ;;  %3126 = vset.pattern.permute.xlu1 %v3264_v6 }
0x109e   :  { %3088 = vmatpush3.bf16.msra.mxu0 %v3436_v23  ;;  %3127 = vset.pattern.permute.xlu0 %v3264_v6  ;;  %v2196_v6 = vld [vmem:[#allocation4 + $0x20] sm:$0xff] }
0x110b   :  { %v1907_v33 = vpop.permute.xlu0 %1906 }
0x110f   :  { %v1879_v40 = vpop.permute.xlu0 %1878 }
0x1168   :  { %v1865_v13 = vpop.f32.mrb[20].mxu1 }
0x1169   :  { %v1869_v18 = vadd.f32 %v1865_v13, %v3478_v29  ;;  %v2936_v12 = vpop.f32.mrb[21].mxu1 }
0x116b   :  { %3224 = vtanh.f32 %v1869_v18  ;;  %v2611_v17 = vmul.f32 -1.442695, %v1869_v18 }
0x116c   :  { %v1790_v14 = vpop.f32.mrb[20].mxu0 }
0x116d   :  { %v1794_v8 = vadd.f32 %v1790_v14, %v3507_v63  ;;  %v2925_v35 = vpop.f32.mrb[21].mxu0 }
0x116f   :  { %3226 = vtanh.f32 %v1794_v8  ;;  %v2610_v19 = vmul.f32 -1.442695, %v1794_v8 }
0x1170   :  { %3228 = vpow2.f32 %v2611_v17 }
0x1171   :  { %3230 = vpow2.f32 %v2610_v19  ;;  %v2184_v19 = vld [vmem:[%s4042_s13] sm:$0xff] }
0x1175   :  { %v3225_v24 = vpop.eup %3224 }
0x1176   :  { %1911 = vrot.lane.b32.xlu1 %v3225_v24, %s3262_s7 }
0x1179   :  { %v3227_v15 = vpop.eup %3226 }
0x117a   :  { %1883 = vrot.lane.b32.xlu1 %v3227_v15, %s3262_s7  ;;  %v3229_v23 = vpop.eup %3228 }
0x117b   :  { %v1901_v20 = vadd.f32 1.0, %v3229_v23  ;;  %v3231_v29 = vpop.eup %3230  ;;  %v2186_v23 = vld [vmem:[%s4042_s13 + $0x10] sm:$0xff] }
0x117c   :  { %v1873_v21 = vadd.f32 1.0, %v3231_v29  ;;  %v2189_v29 = vld [vmem:[%s4042_s13 + $0x28] sm:$0xff] }
0x117d   :  { %3232 = vrcp.f32 %v1901_v20  ;;  %v2187_v20 = vld [vmem:[%s4042_s13 + $0x18] sm:$0xff] }
0x117e   :  { %3234 = vrcp.f32 %v1873_v21  ;;  %v2190_v21 = vld [vmem:[%s4042_s13 + $0x30] sm:$0xff] }
0x1187   :  { %v3233_v22 = vpop.eup %3232 }
0x1188   :  { %v3235_v28 = vpop.eup %3234  ;;  %v1909_v34 = vmul.f32 %v3233_v22, %v1907_v33 }
0x1189   :  { %v1881_v41 = vmul.f32 %v3235_v28, %v1879_v40  ;;  %v2250_v40 = vld [vmem:[%s4044_s9 + $0x10] sm:$0xff] }
0x11e8   :  { %v1912_v63 = vpop.permute.xlu1 %1911 }
0x11e9   :  { %v1914_v27 = vmul.f32 %v3233_v22, %v1912_v63  ;;  %v2269_v63 = vld [vmem:[%s4043_s10 + $0x8] sm:$0xff] }
0x11eb   :  { %1916 = vrot.lane.b32.xlu1 %v1914_v27, %s3259_s25 }
0x11ec   :  { %v1884_v30 = vpop.permute.xlu1 %1883 }
0x11ed   :  { %v1886_v31 = vmul.f32 %v3235_v28, %v1884_v30  ;;  %v2249_v30 = vld [vmem:[%s4044_s9 + $0x8] sm:$0xff] }
0x11ef   :  { %1888 = vrot.lane.b32.xlu1 %v1886_v31, %s3259_s25 }
0x125d   :  { %v1917_v36 = vpop.permute.xlu1 %1916 }
0x125e   :  { %v1919_v38 = vadd.f32 %v1917_v36, %v1909_v34  ;;  %v2270_v36 = vld [vmem:[%s4043_s10 + $0x10] sm:$0xff] }
0x1260   :  { %3236 = vtanh.f32 %v1919_v38 }
0x1261   :  { %v1889_v43 = vpop.permute.xlu1 %1888 }
0x1262   :  { %v1891_v45 = vadd.f32 %v1889_v43, %v1881_v41  ;;  %v2251_v43 = vld [vmem:[%s4044_s9 + $0x18] sm:$0xff] }
0x1264   :  { %3238 = vtanh.f32 %v1891_v45 }
0x126a   :  { %v3237_v48 = vpop.eup %3236 }
0x126b   :  { %1922 = vrot.lane.b32.xlu0 %v3237_v48, %s3262_s7  ;;  %v2185_v48 = vld [vmem:[%s4042_s13 + $0x8] sm:$0xff] }
0x126e   :  { %v3239_v49 = vpop.eup %3238 }
0x126f   :  { %1894 = vrot.lane.b32.xlu1 %v3239_v49, %s3262_s7  ;;  %v2188_v49 = vld [vmem:[%s4042_s13 + $0x20] sm:$0xff] }
0x12dd   :  { %v1923_v39 = vpop.permute.xlu0 %1922 }
0x12de   :  { %v1925_v55 = vmul.f32 %v3233_v22, %v1923_v39  ;;  %v2268_v22 = vld [vmem:[%s4043_s10] sm:$0xff] }
0x12df   :  { %v3095_v27 = vpack.c.bf16 %v2269_v63, %v2268_v22  ;;  %v2259_v22 = vld [vmem:[#allocation5 + $0x38] sm:$0xff] }
0x12e0   :  { %1939 = vrot.lane.b32.xlu0 %v1925_v55, %s3259_s25 }
0x12e1   :  { %v1895_v56 = vpop.permute.xlu1 %1894  ;;  %3096 = vmatprep.subr.bf16.mxu1 %v3095_v27 }
0x12e2   :  { %v1897_v50 = vmul.f32 %v3235_v28, %v1895_v56  ;;  %v2248_v28 = vld [vmem:[%s4044_s9] sm:$0xff]  ;;  %v2191_v56 = vld [vmem:[%s4042_s13 + $0x38] sm:$0xff] }
0x12e3   :  { %v3103_v31 = vpack.c.bf16 %v2249_v30, %v2248_v28 }
0x12e4   :  { %1944 = vrot.lane.b32.xlu0 %v1919_v38, %s3263_s2  ;;  %1929 = vrot.lane.b32.xlu1 %v1897_v50, %s3259_s25  ;;  %v2271_v38 = vld [vmem:[%s4043_s10 + $0x18] sm:$0xff]  ;;  %v2192_v50 = vld [vmem:[#allocation4] sm:$0xff] }
0x12e5   :  { %3104 = vmatprep.subr.bf16.mxu0 %v3103_v31  ;;  %v3099_v41 = vpack.c.bf16 %v2271_v38, %v2270_v36  ;;  %v2632_v36 = vld [vmem:[%s4047_s11] ss:$0 sm:$0xff] }
0x12e8   :  { %1934 = vrot.lane.b32.xlu0 %v1891_v45, %s3263_s2  ;;  %v3107_v45 = vpack.c.bf16 %v2251_v43, %v2250_v40 }
0x1352   :  { %v1940_v57 = vpop.permute.xlu0 %1939 }
0x1353   :  { %v3860_v58 = vsel %vm1927_vm15, %v1940_v57, %v3808_v9 }
0x1354   :  { %1949 = vst.msk [vmem:[#allocation5 + $0x8] sm:$0xff] %vm340_vm2, %v3860_v58  ;;  %2957 = vmatmul.mubr.msk.f32.vlgmr.msra.gmra.mrb[22].mxu1 %vm340_vm2, %v3860_v58 }
0x1355   :  { %3098 = vmatpush3.bf16.msra.mxu1 %v3095_v27 }
0x1356   :  { %v1945_v61 = vpop.permute.xlu0 %1944  ;;  %v1930_v60 = vpop.permute.xlu1 %1929  ;;  %3100 = vmatprep.subr.bf16.mxu1 %v3099_v41 }
0x1357   :  { %v3868_v26 = vsel %vm1926_vm0, %v1930_v60, %v3822_v11  ;;  %v3871_v62 = vsel %vm1927_vm15, %v1945_v61, %v3825_v46 }
0x1358   :  { %1948 = vst.msk [vmem:[#allocation4 + $0x30] sm:$0xff] %vm340_vm2, %v3868_v26  ;;  %2136 = vrot.lane.b32.xlu0 %v3871_v62, %s3259_s25  ;;  %2946 = vmatmul.mubr.msk.f32.vlgmr.msra.gmra.mrb[22].mxu0 %vm340_vm2, %v3868_v26 }
0x1359   :  { %3106 = vmatpush3.bf16.msra.mxu0 %v3103_v31  ;;  %3102 = vmatpush3.bf16.msra.mxu1 %v3099_v41 }
0x135a   :  { %v1935_v51 = vpop.permute.xlu0 %1934  ;;  %3108 = vmatprep.subr.bf16.mxu0 %v3107_v45 }
0x135b   :  { %v3880_v52 = vsel %vm1926_vm0, %v1935_v51, %v3841_v54 }
0x135c   :  { %2108 = vrot.lane.b32.xlu0 %v3880_v52, %s3259_s25 }
0x135d   :  { %3110 = vmatpush3.bf16.msra.mxu0 %v3107_v45 }
0x13ca   :  { %v2137_v54 = vpop.permute.xlu0 %2136 }
0x13ce   :  { %v2109_v14 = vpop.permute.xlu0 %2108 }
0x1427   :  { %v2095_v37 = vpop.f32.mrb[22].mxu1 }
0x1428   :  { %v2099_v25 = vadd.f32 %v2095_v37, %v3483_v32  ;;  %v2958_v0 = vpop.f32.mrb[23].mxu1 }
0x1429   :  { %v3256_v0 = vld [vmem:[%s4041_s12] sm:$0xff] }
0x142a   :  { %3240 = vtanh.f32 %v2099_v25  ;;  %v2615_v47 = vmul.f32 -1.442695, %v2099_v25  ;;  %vm2156_vm1 = vcmp.gt.f32.partialorder %v3256_v0, 7.0 }
0x142b   :  { %v2020_v53 = vpop.f32.mrb[22].mxu0 }
0x142c   :  { %v2024_v1 = vadd.f32 %v2020_v53, %v3505_v59  ;;  %v2947_v2 = vpop.f32.mrb[23].mxu0 }
0x142d   :  { %v3257_v2 = vld [vmem:[%s4041_s12 + $0x8] sm:$0xff] }
0x142e   :  { %3242 = vtanh.f32 %v2024_v1  ;;  %v2614_v4 = vmul.f32 -1.442695, %v2024_v1  ;;  %vm2157_vm3 = vcmp.le.f32.partialorder %v3257_v2, 7.0 }
0x142f   :  { %3244 = vpow2.f32 %v2615_v47 }
0x1430   :  { %3246 = vpow2.f32 %v2614_v4  ;;  %v2193_v4 = vld [vmem:[#allocation4 + $0x8] sm:$0xff] }
0x1434   :  { %v3241_v16 = vpop.eup %3240 }
0x1435   :  { %2141 = vrot.lane.b32.xlu1 %v3241_v16, %s3262_s7 }
0x1438   :  { %v3243_v3 = vpop.eup %3242 }
0x1439   :  { %2113 = vrot.lane.b32.xlu1 %v3243_v3, %s3262_s7  ;;  %v3245_v5 = vpop.eup %3244 }
0x143a   :  { %v2131_v42 = vadd.f32 1.0, %v3245_v5  ;;  %v3247_v32 = vpop.eup %3246  ;;  %v2253_v5 = vld [vmem:[#allocation5 + $0x8] sm:$0xff] }
0x143b   :  { %v2103_v7 = vadd.f32 1.0, %v3247_v32  ;;  %v2194_v32 = vld [vmem:[#allocation4 + $0x10] sm:$0xff] }
0x143c   :  { %3248 = vrcp.f32 %v2131_v42 }
0x143d   :  { %3250 = vrcp.f32 %v2103_v7  ;;  %v2254_v7 = vld [vmem:[#allocation5 + $0x10] sm:$0xff] }
0x1446   :  { %v3249_v9 = vpop.eup %3248 }
0x1447   :  { %v3889_v10 = vpop.eup %3250  ;;  %v2139_v13 = vmul.f32 %v3249_v9, %v2137_v54 }
0x1448   :  { %v2111_v8 = vmul.f32 %v3889_v10, %v2109_v14 }
0x14a7   :  { %v2142_v59 = vpop.permute.xlu1 %2141 }
0x14a8   :  { %v2144_v44 = vmul.f32 %v3249_v9, %v2142_v59 }
0x14aa   :  { %2146 = vrot.lane.b32.xlu1 %v2144_v44, %s3259_s25 }
0x14ab   :  { %v2114_v11 = vpop.permute.xlu1 %2113 }
0x14ac   :  { %v2116_v46 = vmul.f32 %v3889_v10, %v2114_v11  ;;  %v2195_v11 = vld [vmem:[#allocation4 + $0x18] sm:$0xff] }
0x14ae   :  { %2118 = vrot.lane.b32.xlu1 %v2116_v46, %s3259_s25  ;;  %v2255_v46 = vld [vmem:[#allocation5 + $0x18] sm:$0xff] }
0x151c   :  { %v2147_v18 = vpop.permute.xlu1 %2146 }
0x151d   :  { %v2149_v12 = vadd.f32 %v2147_v18, %v2139_v13 }
0x151f   :  { %3252 = vtanh.f32 %v2149_v12 }
0x1520   :  { %v2119_v35 = vpop.permute.xlu1 %2118 }
0x1521   :  { %v2121_v24 = vadd.f32 %v2119_v35, %v2111_v8  ;;  %v2197_v8 = vld [vmem:[#allocation4 + $0x28] sm:$0xff] }
0x1522   :  { %v2257_v35 = vld [vmem:[#allocation5 + $0x28] sm:$0xff] }
0x1523   :  { %3254 = vtanh.f32 %v2121_v24 }
0x1529   :  { %v3253_v15 = vpop.eup %3252 }
0x152a   :  { %2152 = vrot.lane.b32.xlu0 %v3253_v15, %s3262_s7 }
0x152d   :  { %v3255_v17 = vpop.eup %3254 }
0x152e   :  { %2124 = vrot.lane.b32.xlu1 %v3255_v17, %s3262_s7 }
0x1532   :  { %2202 = vperm.xlu1 %3126, %v2184_v19   ;;  %v2198_v19 = vld [vmem:[#allocation4 + $0x30] sm:$0xff] }
0x1536   :  { %2212 = vperm.xlu1 %3126, %v2186_v23   ;;  %v2258_v23 = vld [vmem:[#allocation5 + $0x30] sm:$0xff] }
0x153a   :  { %2217 = vperm.xlu1 %3126, %v2187_v20  }
0x153e   :  { %2227 = vperm.xlu1 %3126, %v2189_v29  }
0x1542   :  { %2232 = vperm.xlu1 %3126, %v2190_v21  }
0x1546   :  { %2164 = vrot.lane.b32.xlu1 %v2121_v24, %s3263_s2 }
0x159c   :  { %v2153_v33 = vpop.permute.xlu0 %2152 }
0x159d   :  { %v2155_v34 = vmul.f32 %v3249_v9, %v2153_v33 }
0x159f   :  { %2169 = vrot.lane.b32.xlu0 %v2155_v34, %s3259_s25 }
0x15a0   :  { %v2125_v39 = vpop.permute.xlu1 %2124 }
0x15a1   :  { %v2127_v55 = vmul.f32 %v3889_v10, %v2125_v39  ;;  %v2256_v10 = vld [vmem:[#allocation5 + $0x20] sm:$0xff] }
0x15a3   :  { %2207 = vperm.xlu0 %3127, %v2185_v48  }
0x15a7   :  { %2222 = vperm.xlu0 %3127, %v2188_v49  }
0x15ab   :  { %2159 = vrot.lane.b32.xlu0 %v2127_v55, %s3259_s25 }
0x15af   :  { %2237 = vperm.xlu0 %3127, %v2191_v56  }
0x15b1   :  { %v2203_v57 = vpop.permute.xlu1 %2202 }
0x15b2   :  { %v2240_v61 = vmul.f32 %v2203_v57, %v2192_v50 }
0x15b3   :  { %2174 = vrot.lane.b32.xlu0 %v2149_v12, %s3263_s2 }
0x15b4   :  { %2987 = vmatprep.mubr.msk.f32.mxu0 %vm340_vm2, %v2240_v61 }
0x15b5   :  { %v2213_v60 = vpop.permute.xlu1 %2212 }
0x15b6   :  { %v2242_v44 = vmul.f32 %v2213_v60, %v2194_v32 }
0x15b9   :  { %v2218_v51 = vpop.permute.xlu1 %2217 }
0x15ba   :  { %v2243_v13 = vmul.f32 %v2218_v51, %v2195_v11  ;;  %v2263_v18 = vmul.f32 %v2255_v46, %v2218_v51 }
0x15bd   :  { %v2228_v37 = vpop.permute.xlu1 %2227 }
0x15be   :  { %v2245_v15 = vmul.f32 %v2228_v37, %v2197_v8  ;;  %v2265_v17 = vmul.f32 %v2257_v35, %v2228_v37 }
0x15c1   :  { %v2233_v25 = vpop.permute.xlu1 %2232 }
0x15c2   :  { %v2246_v29 = vmul.f32 %v2233_v25, %v2198_v19  ;;  %v2266_v21 = vmul.f32 %v2258_v23, %v2233_v25 }
0x15c5   :  { %v2165_v53 = vpop.permute.xlu1 %2164 }
0x15c6   :  { %v2167_v1 = vsel %vm2156_vm1, %v2165_v53, %v3880_v52 }
0x15c7   :  { %2182 = vst.msk [vmem:[%s4045_s16] sm:$0xff] %vm340_vm2, %v2167_v1 }
0x1611   :  { %v2170_v16 = vpop.permute.xlu0 %2169 }
0x1612   :  { %v2172_v3 = vsel %vm2157_vm3, %v2170_v16, %v3860_v58  ;;  %v2262_v58 = vmul.f32 %v2254_v7, %v2213_v60 }
0x1613   :  { %2179 = vst.msk [vmem:[#allocation5] sm:$0xff] %vm340_vm2, %v2172_v3  ;;  %2181 = vst.msk [vmem:[%s4046_s15 + $0x8] sm:$0xff] %vm340_vm2, %v2172_v3 }
0x161a   :  { %v2252_v52 = vld [vmem:[#allocation5] sm:$0xff] }
0x161b   :  { %v2260_v47 = vmul.f32 %v2252_v52, %v2203_v57 }
0x161d   :  { %2967 = vmatprep.mubr.msk.f32.mxu1 %vm340_vm2, %v2260_v47 }
0x1622   :  { %v2208_v42 = vpop.permute.xlu0 %2207 }
0x1623   :  { %v2241_v9 = vmul.f32 %v2208_v42, %v2193_v4  ;;  %v2261_v59 = vmul.f32 %v2253_v5, %v2208_v42 }
0x1625   :  { %2968 = vmatmul.mubr.msk.f32.vlgmr.msra.gmra.mrb[24].mxu1 %vm340_vm2, %v2261_v59  ;;  %2988 = vmatmul.mubr.msk.f32.vlgmr.msra.gmra.mrb[24].mxu0 %vm340_vm2, %v2241_v9 }
0x1626   :  { %v2223_v54 = vpop.permute.xlu0 %2222  ;;  %2970 = vmatprep.mubr.msk.f32.mxu1 %vm340_vm2, %v2262_v58  ;;  %2990 = vmatprep.mubr.msk.f32.mxu0 %vm340_vm2, %v2242_v44 }
0x1627   :  { %v2244_v12 = vmul.f32 %v2223_v54, %v2196_v6  ;;  %v2264_v14 = vmul.f32 %v2256_v10, %v2223_v54 }
0x1629   :  { %2971 = vmatmul.mubr.msk.f32.gmra.mrb[26].mxu1 %vm340_vm2, %v2263_v18  ;;  %2991 = vmatmul.mubr.msk.f32.gmra.mrb[26].mxu0 %vm340_vm2, %v2243_v13 }
0x162a   :  { %v2160_v24 = vpop.permute.xlu0 %2159  ;;  %2973 = vmatprep.mubr.msk.f32.mxu1 %vm340_vm2, %v2264_v14  ;;  %2993 = vmatprep.mubr.msk.f32.mxu0 %vm340_vm2, %v2244_v12 }
0x162b   :  { %v2162_v20 = vsel %vm2156_vm1, %v2160_v24, %v3868_v26 }
0x162c   :  { %2178 = vst.msk [vmem:[#allocation4 + $0x38] sm:$0xff] %vm340_vm2, %v2162_v20  ;;  %2180 = vst.msk [vmem:[%s4046_s15] sm:$0xff] %vm340_vm2, %v2162_v20 }
0x162d   :  { %2974 = vmatmul.mubr.msk.f32.gmra.mrb[28].mxu1 %vm340_vm2, %v2265_v17  ;;  %2994 = vmatmul.mubr.msk.f32.gmra.mrb[28].mxu0 %vm340_vm2, %v2245_v15 }
0x162e   :  { %v2238_v63 = vpop.permute.xlu0 %2237  ;;  %2976 = vmatprep.mubr.msk.f32.mxu1 %vm340_vm2, %v2266_v21  ;;  %2996 = vmatprep.mubr.msk.f32.mxu0 %vm340_vm2, %v2246_v29 }
0x162f   :  { %v2267_v26 = vmul.f32 %v2259_v22, %v2238_v63 }
0x1631   :  { %2977 = vmatmul.mubr.msk.f32.gmra.mrb[30].mxu1 %vm340_vm2, %v2267_v26 }
0x1632   :  { %v2175_v27 = vpop.permute.xlu0 %2174 }
0x1633   :  { %v2199_v28 = vld [vmem:[#allocation4 + $0x38] sm:$0xff]  ;;  %v2177_v30 = vsel %vm2157_vm3, %v2175_v27, %v3871_v62 }
0x1634   :  { %v2247_v31 = vmul.f32 %v2238_v63, %v2199_v28  ;;  %2183 = vst.msk [vmem:[%s4045_s16 + $0x8] sm:$0xff] %vm340_vm2, %v2177_v30 }
0x1636   :  { %2997 = vmatmul.mubr.msk.f32.gmra.mrb[30].mxu0 %vm340_vm2, %v2247_v31 }
0x16f8   :  { %v2969_v33 = vpop.f32.mrb[24].mxu1  ;;  %v2989_v34 = vpop.f32.mrb[24].mxu0 }
0x16f9   :  { %v2497_v38 = vadd.f32 %v2989_v34, %v2969_v33  ;;  %v2362_v40 = vpop.f32.mrb[25].mxu1  ;;  %v2491_v41 = vpop.f32.mrb[25].mxu0 }
0x16fa   :  { %v2492_v43 = vadd.f32 %v2491_v41, %v2362_v40 }
0x16fb   :  { %v2538_v62 = vadd.f32 %v2632_v36, %v2497_v38 }
0x16fc   :  { %v2537_v45 = vadd.f32 %v2632_v36, %v2492_v43  ;;  %v2972_v48 = vpop.f32.mrb[26].mxu1  ;;  %v2992_v49 = vpop.f32.mrb[26].mxu0 }
0x16fd   :  { %2547 = vst.msk [vmem:[%s4048_s14 + $0x8] sm:$0xff] %vm2545_vm4, %v2538_v62  ;;  %v2507_v39 = vadd.f32 %v2992_v49, %v2972_v48  ;;  %v2372_v55 = vpop.f32.mrb[27].mxu1  ;;  %v2501_v56 = vpop.f32.mrb[27].mxu0 }
0x16fe   :  { %2546 = vst.msk [vmem:[%s4048_s14] sm:$0xff] %vm2545_vm4, %v2537_v45  ;;  %v2502_v50 = vadd.f32 %v2501_v56, %v2372_v55 }
0x16ff   :  { %v2540_v57 = vadd.f32 %v2632_v36, %v2507_v39 }
0x1700   :  { %v2539_v61 = vadd.f32 %v2632_v36, %v2502_v50  ;;  %v2975_v60 = vpop.f32.mrb[28].mxu1  ;;  %v2995_v51 = vpop.f32.mrb[28].mxu0 }
0x1701   :  { %2549 = vst.msk [vmem:[%s4048_s14 + $0x18] sm:$0xff] %vm2545_vm4, %v2540_v57  ;;  %v2517_v37 = vadd.f32 %v2995_v51, %v2975_v60  ;;  %v2382_v25 = vpop.f32.mrb[29].mxu1  ;;  %v2511_v0 = vpop.f32.mrb[29].mxu0 }
0x1702   :  { %2548 = vst.msk [vmem:[%s4048_s14 + $0x10] sm:$0xff] %vm2545_vm4, %v2539_v61  ;;  %v2512_v53 = vadd.f32 %v2511_v0, %v2382_v25 }
0x1703   :  { %v2542_v1 = vadd.f32 %v2632_v36, %v2517_v37 }
0x1704   :  { %v2541_v2 = vadd.f32 %v2632_v36, %v2512_v53  ;;  %v2978_v16 = vpop.f32.mrb[30].mxu1 }
0x1705   :  { %2551 = vst.msk [vmem:[%s4048_s14 + $0x28] sm:$0xff] %vm2545_vm4, %v2542_v1  ;;  %v2392_v3 = vpop.f32.mrb[31].mxu1 }
0x1706   :  { %2550 = vst.msk [vmem:[%s4048_s14 + $0x20] sm:$0xff] %vm2545_vm4, %v2541_v2 }
0x1709   :  { %v2998_v52 = vpop.f32.mrb[30].mxu0 }
0x170a   :  { %v2527_v47 = vadd.f32 %v2998_v52, %v2978_v16  ;;  %v2521_v4 = vpop.f32.mrb[31].mxu0 }
0x170b   :  { %v2522_v5 = vadd.f32 %v2521_v4, %v2392_v3 }
0x170c   :  { %v2544_v42 = vadd.f32 %v2632_v36, %v2527_v47 }
0x170d   :  { %v2543_v32 = vadd.f32 %v2632_v36, %v2522_v5 }
0x170e   :  { %2553 = vst.msk [vmem:[%s4048_s14 + $0x38] sm:$0xff] %vm2545_vm4, %v2544_v42 }
0x170f   :  { %2552 = vst.msk [vmem:[%s4048_s14 + $0x30] sm:$0xff] %vm2545_vm4, %v2543_v32 }

</bundles_post_ra>
